<compile_context>
chip_gen: v6e
topology: v6e:2x2x1
jax: 0.10.0
libtpu: 0.0.40
codegen_flags: <defaults>
</compile_context>

<pallas_src>
import functools

import jax
import jax.numpy as jnp
from jax.experimental import pallas as pl
from jax.experimental.pallas import tpu as pltpu

KH = KW = 7
PAD = 3            # autopad(7) = 3
BN_EPS = 1e-5


def _conv_kernel(x_ref, wdw_ref, wpw_ref, y_ref, sums_ref, *, C1, H, W):
    """Fused depthwise-7x7 + pointwise-1x1 for one batch image.

    x_ref:    (1, H+6, LANE)   zero-padded input, W folded into the lane axis, lane axis
                               padded up to a multiple of 128 (padding never read)
    wdw_ref:  (49, W*C1)       depthwise taps (flat tap id = kh*7+kw), tiled across W
    wpw_ref:  (W*C1, W*C2)     block-diagonal pointwise weight (kron(I_W, w_pw))
    y_ref:    (1, H, W*C2)     pre-BN conv output (lane-dense)
    sums_ref: (1, 2, W*C2)     row 0: per-column sum, row 1: per-column sum of squares
    """
    WC1 = W * C1
    xp = x_ref[0]                                           # (H+6, LANE)

    # Depthwise 7x7 on the VPU.  The 7 lane shifts are hoisted out of the kh loop so the
    # inner loop only does cheap sublane slices of an already-shifted slab.
    acc = jnp.zeros((H, WC1), jnp.float32)
    for kw in range(KW):
        xs = xp[:, kw * C1:kw * C1 + WC1]                   # one lane shift per kw
        for kh in range(KH):
            acc = acc + xs[kh:kh + H, :] * wdw_ref[kh * KW + kw]

    # Pointwise 1x1: one MXU contraction in the W-folded layout (no in-kernel relayout).
    # TODO(synk): at production channel counts, cast operands to bf16 (keep f32 accumulate),
    # tile H so M >= 128/256, and drop the kron in favor of a (H*W, C1) x (C1, C2) dot.
    y = jnp.dot(acc, wpw_ref[...], preferred_element_type=jnp.float32)   # (H, W*C2)
    y_ref[0] = y

    # One-pass partial BatchNorm statistics (reduced over W and N in the wrapper).
    sums_ref[0, 0:1, :] = jnp.sum(y, axis=0, keepdims=True)
    sums_ref[0, 1:2, :] = jnp.sum(y * y, axis=0, keepdims=True)


def _bn_silu_kernel(y_ref, scale_ref, shift_ref, o_ref):
    """z = y*scale + shift; out = SiLU(z) = z*sigmoid(z).  One lane-dense block."""
    z = y_ref[...] * scale_ref[...] + shift_ref[...]
    o_ref[...] = z * (1.0 / (1.0 + jnp.exp(-z)))            # exact reciprocal (correctness)


def sepconv7x7(x_nchw, w_dw, w_pw, gamma, beta):
    """x_nchw: (N, C1, H, W); w_dw: (7,7,C1); w_pw: (C1,C2); gamma/beta: (C2,)."""
    N, C1, H, W = x_nchw.shape
    C2 = w_pw.shape[1]
    WC1, WC2 = W * C1, W * C2
    Hp, Wp = H + 2 * PAD, W + 2 * PAD
    lane = max(128, -(-(Wp * C1) // 128) * 128)             # folded lane width, 128-aligned

    # ---- wrapper-side layout plumbing (cheap XLA pads / reshapes / tiles) ----
    x = jnp.transpose(x_nchw, (0, 2, 3, 1)).astype(jnp.float32)        # NCHW -> NHWC
    xpad = jnp.pad(x, ((0, 0), (PAD, PAD), (PAD, PAD), (0, 0)))        # 'same' halo
    xfold = xpad.reshape(N, Hp, Wp * C1)                               # fold W into lanes
    xfold = jnp.pad(xfold, ((0, 0), (0, 0), (0, lane - Wp * C1)))      # lane-dense block
    wdw_flat = jnp.tile(w_dw.astype(jnp.float32), (1, 1, W)).reshape(KH * KW, WC1)
    # TODO(synk): the kron weight grows as W^2*C1*C2; for large W fold only a W-tile of
    # 128-256 lanes and reuse one weight tile via a constant index_map (v7x: 64 MiB VMEM).
    wpw_exp = jnp.kron(jnp.eye(W, dtype=jnp.float32),
                       w_pw.astype(jnp.float32))                       # (W*C1, W*C2)

    # TODO(synk): for production H, tile the grid as (N, H//Ht) with a 6-row halo
    # (overlapping index_map) so DMA/compute overlap and blocks stay within scoped VMEM.
    y, psums = pl.pallas_call(
        functools.partial(_conv_kernel, C1=C1, H=H, W=W),
        out_shape=(jax.ShapeDtypeStruct((N, H, WC2), jnp.float32),
                   jax.ShapeDtypeStruct((N, 2, WC2), jnp.float32)),
        grid=(N,),
        in_specs=[
            pl.BlockSpec((1, Hp, lane), lambda n: (n, 0, 0)),
            pl.BlockSpec((KH * KW, WC1), lambda n: (0, 0)),
            pl.BlockSpec((WC1, WC2), lambda n: (0, 0)),
        ],
        out_specs=(
            pl.BlockSpec((1, H, WC2), lambda n: (n, 0, 0)),
            pl.BlockSpec((1, 2, WC2), lambda n: (n, 0, 0)),
        ),
        compiler_params=pltpu.CompilerParams(
            dimension_semantics=("parallel",),
            vmem_limit_bytes=32 * 1024 * 1024),
    )(xfold, wdw_flat, wpw_exp)

    # Finalize training-mode BN statistics over the full (N, H, W) extent (tiny).
    tot = jnp.sum(psums.reshape(N, 2, W, C2), axis=(0, 2))             # (2, C2)
    cnt = jnp.float32(N * H * W)
    mean = tot[0] / cnt
    var = jnp.maximum(tot[1] / cnt - mean * mean, 0.0)                 # biased variance
    scale = gamma.astype(jnp.float32) * jax.lax.rsqrt(var + BN_EPS)
    shift = beta.astype(jnp.float32) - mean * scale
    scale_t = jnp.tile(scale, W).reshape(1, WC2)                       # match W-folded lanes
    shift_t = jnp.tile(shift, W).reshape(1, WC2)

    # BN + SiLU over the whole slab in ONE grid step (lane-dense, unmasked stores).
    NH = N * H
    y2d = y.reshape(NH, WC2)
    out2d = pl.pallas_call(
        _bn_silu_kernel,
        out_shape=jax.ShapeDtypeStruct((NH, WC2), jnp.float32),
        grid=(1,),
        in_specs=[
            pl.BlockSpec((NH, WC2), lambda i: (0, 0)),
            pl.BlockSpec((1, WC2), lambda i: (0, 0)),
            pl.BlockSpec((1, WC2), lambda i: (0, 0)),
        ],
        out_specs=pl.BlockSpec((NH, WC2), lambda i: (0, 0)),
        compiler_params=pltpu.CompilerParams(
            vmem_limit_bytes=32 * 1024 * 1024),
    )(y2d, scale_t, shift_t)

    out = out2d.reshape(N, H, W, C2)
    return jnp.transpose(out, (0, 3, 1, 2))                            # NHWC -> NCHW


def sepconv7x7_ref(x_nchw, w_dw, w_pw, gamma, beta):
    """Plain-JAX reference with identical semantics (training-mode BN)."""
    N, C1, H, W = x_nchw.shape
    x = jnp.transpose(x_nchw, (0, 2, 3, 1)).astype(jnp.float32)
    ydw = jax.lax.conv_general_dilated(
        x, w_dw.reshape(KH, KW, 1, C1).astype(jnp.float32),
        window_strides=(1, 1), padding="SAME",
        dimension_numbers=("NHWC", "HWIO", "NHWC"),
        feature_group_count=C1)
    ypw = jnp.einsum("nhwc,cd->nhwd", ydw, w_pw.astype(jnp.float32))
    mean = jnp.mean(ypw, axis=(0, 1, 2))
    var = jnp.mean((ypw - mean) ** 2, axis=(0, 1, 2))
    ybn = (ypw - mean) * jax.lax.rsqrt(var + BN_EPS) * gamma + beta
    return jnp.transpose(jax.nn.silu(ybn), (0, 3, 1, 2))


if __name__ == "__main__":
    N, C1, C2, H, W = 2, 4, 8, 16, 16
    key = jax.random.PRNGKey(0)
    kx, kdw, kpw = jax.random.split(key, 3)

    x = jax.random.normal(kx, (N, C1, H, W), jnp.float32)

    # Deterministic PyTorch-style fan-in uniform init.
    b_dw = 1.0 / (1 * KH * KW) ** 0.5            # depthwise: fan_in = 1*7*7
    w_dw = jax.random.uniform(kdw, (KH, KW, C1), jnp.float32, -b_dw, b_dw)
    b_pw = 1.0 / (C1 * 1 * 1) ** 0.5             # pointwise: fan_in = C1
    w_pw = jax.random.uniform(kpw, (C1, C2), jnp.float32, -b_pw, b_pw)

    gamma = jnp.ones((C2,), jnp.float32)         # BatchNorm2d affine defaults
    beta = jnp.zeros((C2,), jnp.float32)

    out = jax.jit(sepconv7x7)(x, w_dw, w_pw, gamma, beta)
    jax.block_until_ready(out)

    ref = sepconv7x7_ref(x, w_dw, w_pw, gamma, beta)
    assert out.shape == (N, C2, H, W)
    err = float(jnp.max(jnp.abs(out - ref)))
    assert jnp.allclose(out, ref, atol=2e-3, rtol=2e-3), err

    print("KERNEL_OK")
</pallas_src>

<mosaic_0001>
module attributes {stable_mosaic.version = 11 : i64} {
  func.func @_conv_kernel(%arg0: i32, %arg1: memref<1x22x128xf32, #tpu.memory_space<vmem>>, %arg2: memref<49x64xf32, #tpu.memory_space<vmem>>, %arg3: memref<64x128xf32, #tpu.memory_space<vmem>>, %arg4: memref<1x16x128xf32, #tpu.memory_space<vmem>>, %arg5: memref<1x2x128xf32, #tpu.memory_space<vmem>>) attributes {dimension_semantics = [#tpu.dimension_semantics<parallel>], iteration_bounds = array<i64: 2>, scalar_prefetch = 0 : i64, scratch_operands = 0 : i64, tpu.core_type = #tpu.core_type<tc>, window_params = [{transform_indices = @transform_0, window_bounds = array<i64: 1, 22, 128>}, {pipeline_mode = #tpu.pipeline_mode<synchronous>, transform_indices = @transform_1, window_bounds = array<i64: 49, 64>}, {pipeline_mode = #tpu.pipeline_mode<synchronous>, transform_indices = @transform_2, window_bounds = array<i64: 64, 128>}, {transform_indices = @transform_3, window_bounds = array<i64: 1, 16, 128>}, {transform_indices = @transform_4, window_bounds = array<i64: 1, 2, 128>}]} {
    %c0 = arith.constant 0 : index
    %c0_0 = arith.constant 0 : index
    %c0_1 = arith.constant 0 : index
    %0 = vector.load %arg1[%c0, %c0_0, %c0_1] : memref<1x22x128xf32, #tpu.memory_space<vmem>>, vector<1x22x128xf32>
    %1 = vector.shape_cast %0 : vector<1x22x128xf32> to vector<22x128xf32>
    %cst = arith.constant 0.000000e+00 : f32
    %2 = vector.broadcast %cst : f32 to vector<16x64xf32>
    %3 = vector.extract_strided_slice %1 {offsets = [0, 0], sizes = [22, 64], strides = [1, 1]} : vector<22x128xf32> to vector<22x64xf32>
    %4 = vector.extract_strided_slice %3 {offsets = [0, 0], sizes = [16, 64], strides = [1, 1]} : vector<22x64xf32> to vector<16x64xf32>
    %c0_2 = arith.constant 0 : index
    %c0_3 = arith.constant 0 : index
    %5 = vector.load %arg2[%c0_2, %c0_3] : memref<49x64xf32, #tpu.memory_space<vmem>>, vector<1x64xf32>
    %6 = vector.shape_cast %5 : vector<1x64xf32> to vector<64xf32>
    %7 = vector.shape_cast %6 : vector<64xf32> to vector<1x64xf32>
    %8 = vector.broadcast %7 : vector<1x64xf32> to vector<16x64xf32>
    %9 = arith.mulf %4, %8 : vector<16x64xf32>
    %10 = arith.addf %2, %9 : vector<16x64xf32>
    %11 = vector.extract_strided_slice %3 {offsets = [1, 0], sizes = [16, 64], strides = [1, 1]} : vector<22x64xf32> to vector<16x64xf32>
    %c7 = arith.constant 7 : index
    %c0_4 = arith.constant 0 : index
    %12 = vector.load %arg2[%c7, %c0_4] : memref<49x64xf32, #tpu.memory_space<vmem>>, vector<1x64xf32>
    %13 = vector.shape_cast %12 : vector<1x64xf32> to vector<64xf32>
    %14 = vector.shape_cast %13 : vector<64xf32> to vector<1x64xf32>
    %15 = vector.broadcast %14 : vector<1x64xf32> to vector<16x64xf32>
    %16 = arith.mulf %11, %15 : vector<16x64xf32>
    %17 = arith.addf %10, %16 : vector<16x64xf32>
    %18 = vector.extract_strided_slice %3 {offsets = [2, 0], sizes = [16, 64], strides = [1, 1]} : vector<22x64xf32> to vector<16x64xf32>
    %c14 = arith.constant 14 : index
    %c0_5 = arith.constant 0 : index
    %19 = vector.load %arg2[%c14, %c0_5] : memref<49x64xf32, #tpu.memory_space<vmem>>, vector<1x64xf32>
    %20 = vector.shape_cast %19 : vector<1x64xf32> to vector<64xf32>
    %21 = vector.shape_cast %20 : vector<64xf32> to vector<1x64xf32>
    %22 = vector.broadcast %21 : vector<1x64xf32> to vector<16x64xf32>
    %23 = arith.mulf %18, %22 : vector<16x64xf32>
    %24 = arith.addf %17, %23 : vector<16x64xf32>
    %25 = vector.extract_strided_slice %3 {offsets = [3, 0], sizes = [16, 64], strides = [1, 1]} : vector<22x64xf32> to vector<16x64xf32>
    %c21 = arith.constant 21 : index
    %c0_6 = arith.constant 0 : index
    %26 = vector.load %arg2[%c21, %c0_6] : memref<49x64xf32, #tpu.memory_space<vmem>>, vector<1x64xf32>
    %27 = vector.shape_cast %26 : vector<1x64xf32> to vector<64xf32>
    %28 = vector.shape_cast %27 : vector<64xf32> to vector<1x64xf32>
    %29 = vector.broadcast %28 : vector<1x64xf32> to vector<16x64xf32>
    %30 = arith.mulf %25, %29 : vector<16x64xf32>
    %31 = arith.addf %24, %30 : vector<16x64xf32>
    %32 = vector.extract_strided_slice %3 {offsets = [4, 0], sizes = [16, 64], strides = [1, 1]} : vector<22x64xf32> to vector<16x64xf32>
    %c28 = arith.constant 28 : index
    %c0_7 = arith.constant 0 : index
    %33 = vector.load %arg2[%c28, %c0_7] : memref<49x64xf32, #tpu.memory_space<vmem>>, vector<1x64xf32>
    %34 = vector.shape_cast %33 : vector<1x64xf32> to vector<64xf32>
    %35 = vector.shape_cast %34 : vector<64xf32> to vector<1x64xf32>
    %36 = vector.broadcast %35 : vector<1x64xf32> to vector<16x64xf32>
    %37 = arith.mulf %32, %36 : vector<16x64xf32>
    %38 = arith.addf %31, %37 : vector<16x64xf32>
    %39 = vector.extract_strided_slice %3 {offsets = [5, 0], sizes = [16, 64], strides = [1, 1]} : vector<22x64xf32> to vector<16x64xf32>
    %c35 = arith.constant 35 : index
    %c0_8 = arith.constant 0 : index
    %40 = vector.load %arg2[%c35, %c0_8] : memref<49x64xf32, #tpu.memory_space<vmem>>, vector<1x64xf32>
    %41 = vector.shape_cast %40 : vector<1x64xf32> to vector<64xf32>
    %42 = vector.shape_cast %41 : vector<64xf32> to vector<1x64xf32>
    %43 = vector.broadcast %42 : vector<1x64xf32> to vector<16x64xf32>
    %44 = arith.mulf %39, %43 : vector<16x64xf32>
    %45 = arith.addf %38, %44 : vector<16x64xf32>
    %46 = vector.extract_strided_slice %3 {offsets = [6, 0], sizes = [16, 64], strides = [1, 1]} : vector<22x64xf32> to vector<16x64xf32>
    %c42 = arith.constant 42 : index
    %c0_9 = arith.constant 0 : index
    %47 = vector.load %arg2[%c42, %c0_9] : memref<49x64xf32, #tpu.memory_space<vmem>>, vector<1x64xf32>
    %48 = vector.shape_cast %47 : vector<1x64xf32> to vector<64xf32>
    %49 = vector.shape_cast %48 : vector<64xf32> to vector<1x64xf32>
    %50 = vector.broadcast %49 : vector<1x64xf32> to vector<16x64xf32>
    %51 = arith.mulf %46, %50 : vector<16x64xf32>
    %52 = arith.addf %45, %51 : vector<16x64xf32>
    %53 = vector.extract_strided_slice %1 {offsets = [0, 4], sizes = [22, 64], strides = [1, 1]} : vector<22x128xf32> to vector<22x64xf32>
    %54 = vector.extract_strided_slice %53 {offsets = [0, 0], sizes = [16, 64], strides = [1, 1]} : vector<22x64xf32> to vector<16x64xf32>
    %c1 = arith.constant 1 : index
    %c0_10 = arith.constant 0 : index
    %55 = vector.load %arg2[%c1, %c0_10] : memref<49x64xf32, #tpu.memory_space<vmem>>, vector<1x64xf32>
    %56 = vector.shape_cast %55 : vector<1x64xf32> to vector<64xf32>
    %57 = vector.shape_cast %56 : vector<64xf32> to vector<1x64xf32>
    %58 = vector.broadcast %57 : vector<1x64xf32> to vector<16x64xf32>
    %59 = arith.mulf %54, %58 : vector<16x64xf32>
    %60 = arith.addf %52, %59 : vector<16x64xf32>
    %61 = vector.extract_strided_slice %53 {offsets = [1, 0], sizes = [16, 64], strides = [1, 1]} : vector<22x64xf32> to vector<16x64xf32>
    %c8 = arith.constant 8 : index
    %c0_11 = arith.constant 0 : index
    %62 = vector.load %arg2[%c8, %c0_11] : memref<49x64xf32, #tpu.memory_space<vmem>>, vector<1x64xf32>
    %63 = vector.shape_cast %62 : vector<1x64xf32> to vector<64xf32>
    %64 = vector.shape_cast %63 : vector<64xf32> to vector<1x64xf32>
    %65 = vector.broadcast %64 : vector<1x64xf32> to vector<16x64xf32>
    %66 = arith.mulf %61, %65 : vector<16x64xf32>
    %67 = arith.addf %60, %66 : vector<16x64xf32>
    %68 = vector.extract_strided_slice %53 {offsets = [2, 0], sizes = [16, 64], strides = [1, 1]} : vector<22x64xf32> to vector<16x64xf32>
    %c15 = arith.constant 15 : index
    %c0_12 = arith.constant 0 : index
    %69 = vector.load %arg2[%c15, %c0_12] : memref<49x64xf32, #tpu.memory_space<vmem>>, vector<1x64xf32>
    %70 = vector.shape_cast %69 : vector<1x64xf32> to vector<64xf32>
    %71 = vector.shape_cast %70 : vector<64xf32> to vector<1x64xf32>
    %72 = vector.broadcast %71 : vector<1x64xf32> to vector<16x64xf32>
    %73 = arith.mulf %68, %72 : vector<16x64xf32>
    %74 = arith.addf %67, %73 : vector<16x64xf32>
    %75 = vector.extract_strided_slice %53 {offsets = [3, 0], sizes = [16, 64], strides = [1, 1]} : vector<22x64xf32> to vector<16x64xf32>
    %c22 = arith.constant 22 : index
    %c0_13 = arith.constant 0 : index
    %76 = vector.load %arg2[%c22, %c0_13] : memref<49x64xf32, #tpu.memory_space<vmem>>, vector<1x64xf32>
    %77 = vector.shape_cast %76 : vector<1x64xf32> to vector<64xf32>
    %78 = vector.shape_cast %77 : vector<64xf32> to vector<1x64xf32>
    %79 = vector.broadcast %78 : vector<1x64xf32> to vector<16x64xf32>
    %80 = arith.mulf %75, %79 : vector<16x64xf32>
    %81 = arith.addf %74, %80 : vector<16x64xf32>
    %82 = vector.extract_strided_slice %53 {offsets = [4, 0], sizes = [16, 64], strides = [1, 1]} : vector<22x64xf32> to vector<16x64xf32>
    %c29 = arith.constant 29 : index
    %c0_14 = arith.constant 0 : index
    %83 = vector.load %arg2[%c29, %c0_14] : memref<49x64xf32, #tpu.memory_space<vmem>>, vector<1x64xf32>
    %84 = vector.shape_cast %83 : vector<1x64xf32> to vector<64xf32>
    %85 = vector.shape_cast %84 : vector<64xf32> to vector<1x64xf32>
    %86 = vector.broadcast %85 : vector<1x64xf32> to vector<16x64xf32>
    %87 = arith.mulf %82, %86 : vector<16x64xf32>
    %88 = arith.addf %81, %87 : vector<16x64xf32>
    %89 = vector.extract_strided_slice %53 {offsets = [5, 0], sizes = [16, 64], strides = [1, 1]} : vector<22x64xf32> to vector<16x64xf32>
    %c36 = arith.constant 36 : index
    %c0_15 = arith.constant 0 : index
    %90 = vector.load %arg2[%c36, %c0_15] : memref<49x64xf32, #tpu.memory_space<vmem>>, vector<1x64xf32>
    %91 = vector.shape_cast %90 : vector<1x64xf32> to vector<64xf32>
    %92 = vector.shape_cast %91 : vector<64xf32> to vector<1x64xf32>
    %93 = vector.broadcast %92 : vector<1x64xf32> to vector<16x64xf32>
    %94 = arith.mulf %89, %93 : vector<16x64xf32>
    %95 = arith.addf %88, %94 : vector<16x64xf32>
    %96 = vector.extract_strided_slice %53 {offsets = [6, 0], sizes = [16, 64], strides = [1, 1]} : vector<22x64xf32> to vector<16x64xf32>
    %c43 = arith.constant 43 : index
    %c0_16 = arith.constant 0 : index
    %97 = vector.load %arg2[%c43, %c0_16] : memref<49x64xf32, #tpu.memory_space<vmem>>, vector<1x64xf32>
    %98 = vector.shape_cast %97 : vector<1x64xf32> to vector<64xf32>
    %99 = vector.shape_cast %98 : vector<64xf32> to vector<1x64xf32>
    %100 = vector.broadcast %99 : vector<1x64xf32> to vector<16x64xf32>
    %101 = arith.mulf %96, %100 : vector<16x64xf32>
    %102 = arith.addf %95, %101 : vector<16x64xf32>
    %103 = vector.extract_strided_slice %1 {offsets = [0, 8], sizes = [22, 64], strides = [1, 1]} : vector<22x128xf32> to vector<22x64xf32>
    %104 = vector.extract_strided_slice %103 {offsets = [0, 0], sizes = [16, 64], strides = [1, 1]} : vector<22x64xf32> to vector<16x64xf32>
    %c2 = arith.constant 2 : index
    %c0_17 = arith.constant 0 : index
    %105 = vector.load %arg2[%c2, %c0_17] : memref<49x64xf32, #tpu.memory_space<vmem>>, vector<1x64xf32>
    %106 = vector.shape_cast %105 : vector<1x64xf32> to vector<64xf32>
    %107 = vector.shape_cast %106 : vector<64xf32> to vector<1x64xf32>
    %108 = vector.broadcast %107 : vector<1x64xf32> to vector<16x64xf32>
    %109 = arith.mulf %104, %108 : vector<16x64xf32>
    %110 = arith.addf %102, %109 : vector<16x64xf32>
    %111 = vector.extract_strided_slice %103 {offsets = [1, 0], sizes = [16, 64], strides = [1, 1]} : vector<22x64xf32> to vector<16x64xf32>
    %c9 = arith.constant 9 : index
    %c0_18 = arith.constant 0 : index
    %112 = vector.load %arg2[%c9, %c0_18] : memref<49x64xf32, #tpu.memory_space<vmem>>, vector<1x64xf32>
    %113 = vector.shape_cast %112 : vector<1x64xf32> to vector<64xf32>
    %114 = vector.shape_cast %113 : vector<64xf32> to vector<1x64xf32>
    %115 = vector.broadcast %114 : vector<1x64xf32> to vector<16x64xf32>
    %116 = arith.mulf %111, %115 : vector<16x64xf32>
    %117 = arith.addf %110, %116 : vector<16x64xf32>
    %118 = vector.extract_strided_slice %103 {offsets = [2, 0], sizes = [16, 64], strides = [1, 1]} : vector<22x64xf32> to vector<16x64xf32>
    %c16 = arith.constant 16 : index
    %c0_19 = arith.constant 0 : index
    %119 = vector.load %arg2[%c16, %c0_19] : memref<49x64xf32, #tpu.memory_space<vmem>>, vector<1x64xf32>
    %120 = vector.shape_cast %119 : vector<1x64xf32> to vector<64xf32>
    %121 = vector.shape_cast %120 : vector<64xf32> to vector<1x64xf32>
    %122 = vector.broadcast %121 : vector<1x64xf32> to vector<16x64xf32>
    %123 = arith.mulf %118, %122 : vector<16x64xf32>
    %124 = arith.addf %117, %123 : vector<16x64xf32>
    %125 = vector.extract_strided_slice %103 {offsets = [3, 0], sizes = [16, 64], strides = [1, 1]} : vector<22x64xf32> to vector<16x64xf32>
    %c23 = arith.constant 23 : index
    %c0_20 = arith.constant 0 : index
    %126 = vector.load %arg2[%c23, %c0_20] : memref<49x64xf32, #tpu.memory_space<vmem>>, vector<1x64xf32>
    %127 = vector.shape_cast %126 : vector<1x64xf32> to vector<64xf32>
    %128 = vector.shape_cast %127 : vector<64xf32> to vector<1x64xf32>
    %129 = vector.broadcast %128 : vector<1x64xf32> to vector<16x64xf32>
    %130 = arith.mulf %125, %129 : vector<16x64xf32>
    %131 = arith.addf %124, %130 : vector<16x64xf32>
    %132 = vector.extract_strided_slice %103 {offsets = [4, 0], sizes = [16, 64], strides = [1, 1]} : vector<22x64xf32> to vector<16x64xf32>
    %c30 = arith.constant 30 : index
    %c0_21 = arith.constant 0 : index
    %133 = vector.load %arg2[%c30, %c0_21] : memref<49x64xf32, #tpu.memory_space<vmem>>, vector<1x64xf32>
    %134 = vector.shape_cast %133 : vector<1x64xf32> to vector<64xf32>
    %135 = vector.shape_cast %134 : vector<64xf32> to vector<1x64xf32>
    %136 = vector.broadcast %135 : vector<1x64xf32> to vector<16x64xf32>
    %137 = arith.mulf %132, %136 : vector<16x64xf32>
    %138 = arith.addf %131, %137 : vector<16x64xf32>
    %139 = vector.extract_strided_slice %103 {offsets = [5, 0], sizes = [16, 64], strides = [1, 1]} : vector<22x64xf32> to vector<16x64xf32>
    %c37 = arith.constant 37 : index
    %c0_22 = arith.constant 0 : index
    %140 = vector.load %arg2[%c37, %c0_22] : memref<49x64xf32, #tpu.memory_space<vmem>>, vector<1x64xf32>
    %141 = vector.shape_cast %140 : vector<1x64xf32> to vector<64xf32>
    %142 = vector.shape_cast %141 : vector<64xf32> to vector<1x64xf32>
    %143 = vector.broadcast %142 : vector<1x64xf32> to vector<16x64xf32>
    %144 = arith.mulf %139, %143 : vector<16x64xf32>
    %145 = arith.addf %138, %144 : vector<16x64xf32>
    %146 = vector.extract_strided_slice %103 {offsets = [6, 0], sizes = [16, 64], strides = [1, 1]} : vector<22x64xf32> to vector<16x64xf32>
    %c44 = arith.constant 44 : index
    %c0_23 = arith.constant 0 : index
    %147 = vector.load %arg2[%c44, %c0_23] : memref<49x64xf32, #tpu.memory_space<vmem>>, vector<1x64xf32>
    %148 = vector.shape_cast %147 : vector<1x64xf32> to vector<64xf32>
    %149 = vector.shape_cast %148 : vector<64xf32> to vector<1x64xf32>
    %150 = vector.broadcast %149 : vector<1x64xf32> to vector<16x64xf32>
    %151 = arith.mulf %146, %150 : vector<16x64xf32>
    %152 = arith.addf %145, %151 : vector<16x64xf32>
    %153 = vector.extract_strided_slice %1 {offsets = [0, 12], sizes = [22, 64], strides = [1, 1]} : vector<22x128xf32> to vector<22x64xf32>
    %154 = vector.extract_strided_slice %153 {offsets = [0, 0], sizes = [16, 64], strides = [1, 1]} : vector<22x64xf32> to vector<16x64xf32>
    %c3 = arith.constant 3 : index
    %c0_24 = arith.constant 0 : index
    %155 = vector.load %arg2[%c3, %c0_24] : memref<49x64xf32, #tpu.memory_space<vmem>>, vector<1x64xf32>
    %156 = vector.shape_cast %155 : vector<1x64xf32> to vector<64xf32>
    %157 = vector.shape_cast %156 : vector<64xf32> to vector<1x64xf32>
    %158 = vector.broadcast %157 : vector<1x64xf32> to vector<16x64xf32>
    %159 = arith.mulf %154, %158 : vector<16x64xf32>
    %160 = arith.addf %152, %159 : vector<16x64xf32>
    %161 = vector.extract_strided_slice %153 {offsets = [1, 0], sizes = [16, 64], strides = [1, 1]} : vector<22x64xf32> to vector<16x64xf32>
    %c10 = arith.constant 10 : index
    %c0_25 = arith.constant 0 : index
    %162 = vector.load %arg2[%c10, %c0_25] : memref<49x64xf32, #tpu.memory_space<vmem>>, vector<1x64xf32>
    %163 = vector.shape_cast %162 : vector<1x64xf32> to vector<64xf32>
    %164 = vector.shape_cast %163 : vector<64xf32> to vector<1x64xf32>
    %165 = vector.broadcast %164 : vector<1x64xf32> to vector<16x64xf32>
    %166 = arith.mulf %161, %165 : vector<16x64xf32>
    %167 = arith.addf %160, %166 : vector<16x64xf32>
    %168 = vector.extract_strided_slice %153 {offsets = [2, 0], sizes = [16, 64], strides = [1, 1]} : vector<22x64xf32> to vector<16x64xf32>
    %c17 = arith.constant 17 : index
    %c0_26 = arith.constant 0 : index
    %169 = vector.load %arg2[%c17, %c0_26] : memref<49x64xf32, #tpu.memory_space<vmem>>, vector<1x64xf32>
    %170 = vector.shape_cast %169 : vector<1x64xf32> to vector<64xf32>
    %171 = vector.shape_cast %170 : vector<64xf32> to vector<1x64xf32>
    %172 = vector.broadcast %171 : vector<1x64xf32> to vector<16x64xf32>
    %173 = arith.mulf %168, %172 : vector<16x64xf32>
    %174 = arith.addf %167, %173 : vector<16x64xf32>
    %175 = vector.extract_strided_slice %153 {offsets = [3, 0], sizes = [16, 64], strides = [1, 1]} : vector<22x64xf32> to vector<16x64xf32>
    %c24 = arith.constant 24 : index
    %c0_27 = arith.constant 0 : index
    %176 = vector.load %arg2[%c24, %c0_27] : memref<49x64xf32, #tpu.memory_space<vmem>>, vector<1x64xf32>
    %177 = vector.shape_cast %176 : vector<1x64xf32> to vector<64xf32>
    %178 = vector.shape_cast %177 : vector<64xf32> to vector<1x64xf32>
    %179 = vector.broadcast %178 : vector<1x64xf32> to vector<16x64xf32>
    %180 = arith.mulf %175, %179 : vector<16x64xf32>
    %181 = arith.addf %174, %180 : vector<16x64xf32>
    %182 = vector.extract_strided_slice %153 {offsets = [4, 0], sizes = [16, 64], strides = [1, 1]} : vector<22x64xf32> to vector<16x64xf32>
    %c31 = arith.constant 31 : index
    %c0_28 = arith.constant 0 : index
    %183 = vector.load %arg2[%c31, %c0_28] : memref<49x64xf32, #tpu.memory_space<vmem>>, vector<1x64xf32>
    %184 = vector.shape_cast %183 : vector<1x64xf32> to vector<64xf32>
    %185 = vector.shape_cast %184 : vector<64xf32> to vector<1x64xf32>
    %186 = vector.broadcast %185 : vector<1x64xf32> to vector<16x64xf32>
    %187 = arith.mulf %182, %186 : vector<16x64xf32>
    %188 = arith.addf %181, %187 : vector<16x64xf32>
    %189 = vector.extract_strided_slice %153 {offsets = [5, 0], sizes = [16, 64], strides = [1, 1]} : vector<22x64xf32> to vector<16x64xf32>
    %c38 = arith.constant 38 : index
    %c0_29 = arith.constant 0 : index
    %190 = vector.load %arg2[%c38, %c0_29] : memref<49x64xf32, #tpu.memory_space<vmem>>, vector<1x64xf32>
    %191 = vector.shape_cast %190 : vector<1x64xf32> to vector<64xf32>
    %192 = vector.shape_cast %191 : vector<64xf32> to vector<1x64xf32>
    %193 = vector.broadcast %192 : vector<1x64xf32> to vector<16x64xf32>
    %194 = arith.mulf %189, %193 : vector<16x64xf32>
    %195 = arith.addf %188, %194 : vector<16x64xf32>
    %196 = vector.extract_strided_slice %153 {offsets = [6, 0], sizes = [16, 64], strides = [1, 1]} : vector<22x64xf32> to vector<16x64xf32>
    %c45 = arith.constant 45 : index
    %c0_30 = arith.constant 0 : index
    %197 = vector.load %arg2[%c45, %c0_30] : memref<49x64xf32, #tpu.memory_space<vmem>>, vector<1x64xf32>
    %198 = vector.shape_cast %197 : vector<1x64xf32> to vector<64xf32>
    %199 = vector.shape_cast %198 : vector<64xf32> to vector<1x64xf32>
    %200 = vector.broadcast %199 : vector<1x64xf32> to vector<16x64xf32>
    %201 = arith.mulf %196, %200 : vector<16x64xf32>
    %202 = arith.addf %195, %201 : vector<16x64xf32>
    %203 = vector.extract_strided_slice %1 {offsets = [0, 16], sizes = [22, 64], strides = [1, 1]} : vector<22x128xf32> to vector<22x64xf32>
    %204 = vector.extract_strided_slice %203 {offsets = [0, 0], sizes = [16, 64], strides = [1, 1]} : vector<22x64xf32> to vector<16x64xf32>
    %c4 = arith.constant 4 : index
    %c0_31 = arith.constant 0 : index
    %205 = vector.load %arg2[%c4, %c0_31] : memref<49x64xf32, #tpu.memory_space<vmem>>, vector<1x64xf32>
    %206 = vector.shape_cast %205 : vector<1x64xf32> to vector<64xf32>
    %207 = vector.shape_cast %206 : vector<64xf32> to vector<1x64xf32>
    %208 = vector.broadcast %207 : vector<1x64xf32> to vector<16x64xf32>
    %209 = arith.mulf %204, %208 : vector<16x64xf32>
    %210 = arith.addf %202, %209 : vector<16x64xf32>
    %211 = vector.extract_strided_slice %203 {offsets = [1, 0], sizes = [16, 64], strides = [1, 1]} : vector<22x64xf32> to vector<16x64xf32>
    %c11 = arith.constant 11 : index
    %c0_32 = arith.constant 0 : index
    %212 = vector.load %arg2[%c11, %c0_32] : memref<49x64xf32, #tpu.memory_space<vmem>>, vector<1x64xf32>
    %213 = vector.shape_cast %212 : vector<1x64xf32> to vector<64xf32>
    %214 = vector.shape_cast %213 : vector<64xf32> to vector<1x64xf32>
    %215 = vector.broadcast %214 : vector<1x64xf32> to vector<16x64xf32>
    %216 = arith.mulf %211, %215 : vector<16x64xf32>
    %217 = arith.addf %210, %216 : vector<16x64xf32>
    %218 = vector.extract_strided_slice %203 {offsets = [2, 0], sizes = [16, 64], strides = [1, 1]} : vector<22x64xf32> to vector<16x64xf32>
    %c18 = arith.constant 18 : index
    %c0_33 = arith.constant 0 : index
    %219 = vector.load %arg2[%c18, %c0_33] : memref<49x64xf32, #tpu.memory_space<vmem>>, vector<1x64xf32>
    %220 = vector.shape_cast %219 : vector<1x64xf32> to vector<64xf32>
    %221 = vector.shape_cast %220 : vector<64xf32> to vector<1x64xf32>
    %222 = vector.broadcast %221 : vector<1x64xf32> to vector<16x64xf32>
    %223 = arith.mulf %218, %222 : vector<16x64xf32>
    %224 = arith.addf %217, %223 : vector<16x64xf32>
    %225 = vector.extract_strided_slice %203 {offsets = [3, 0], sizes = [16, 64], strides = [1, 1]} : vector<22x64xf32> to vector<16x64xf32>
    %c25 = arith.constant 25 : index
    %c0_34 = arith.constant 0 : index
    %226 = vector.load %arg2[%c25, %c0_34] : memref<49x64xf32, #tpu.memory_space<vmem>>, vector<1x64xf32>
    %227 = vector.shape_cast %226 : vector<1x64xf32> to vector<64xf32>
    %228 = vector.shape_cast %227 : vector<64xf32> to vector<1x64xf32>
    %229 = vector.broadcast %228 : vector<1x64xf32> to vector<16x64xf32>
    %230 = arith.mulf %225, %229 : vector<16x64xf32>
    %231 = arith.addf %224, %230 : vector<16x64xf32>
    %232 = vector.extract_strided_slice %203 {offsets = [4, 0], sizes = [16, 64], strides = [1, 1]} : vector<22x64xf32> to vector<16x64xf32>
    %c32 = arith.constant 32 : index
    %c0_35 = arith.constant 0 : index
    %233 = vector.load %arg2[%c32, %c0_35] : memref<49x64xf32, #tpu.memory_space<vmem>>, vector<1x64xf32>
    %234 = vector.shape_cast %233 : vector<1x64xf32> to vector<64xf32>
    %235 = vector.shape_cast %234 : vector<64xf32> to vector<1x64xf32>
    %236 = vector.broadcast %235 : vector<1x64xf32> to vector<16x64xf32>
    %237 = arith.mulf %232, %236 : vector<16x64xf32>
    %238 = arith.addf %231, %237 : vector<16x64xf32>
    %239 = vector.extract_strided_slice %203 {offsets = [5, 0], sizes = [16, 64], strides = [1, 1]} : vector<22x64xf32> to vector<16x64xf32>
    %c39 = arith.constant 39 : index
    %c0_36 = arith.constant 0 : index
    %240 = vector.load %arg2[%c39, %c0_36] : memref<49x64xf32, #tpu.memory_space<vmem>>, vector<1x64xf32>
    %241 = vector.shape_cast %240 : vector<1x64xf32> to vector<64xf32>
    %242 = vector.shape_cast %241 : vector<64xf32> to vector<1x64xf32>
    %243 = vector.broadcast %242 : vector<1x64xf32> to vector<16x64xf32>
    %244 = arith.mulf %239, %243 : vector<16x64xf32>
    %245 = arith.addf %238, %244 : vector<16x64xf32>
    %246 = vector.extract_strided_slice %203 {offsets = [6, 0], sizes = [16, 64], strides = [1, 1]} : vector<22x64xf32> to vector<16x64xf32>
    %c46 = arith.constant 46 : index
    %c0_37 = arith.constant 0 : index
    %247 = vector.load %arg2[%c46, %c0_37] : memref<49x64xf32, #tpu.memory_space<vmem>>, vector<1x64xf32>
    %248 = vector.shape_cast %247 : vector<1x64xf32> to vector<64xf32>
    %249 = vector.shape_cast %248 : vector<64xf32> to vector<1x64xf32>
    %250 = vector.broadcast %249 : vector<1x64xf32> to vector<16x64xf32>
    %251 = arith.mulf %246, %250 : vector<16x64xf32>
    %252 = arith.addf %245, %251 : vector<16x64xf32>
    %253 = vector.extract_strided_slice %1 {offsets = [0, 20], sizes = [22, 64], strides = [1, 1]} : vector<22x128xf32> to vector<22x64xf32>
    %254 = vector.extract_strided_slice %253 {offsets = [0, 0], sizes = [16, 64], strides = [1, 1]} : vector<22x64xf32> to vector<16x64xf32>
    %c5 = arith.constant 5 : index
    %c0_38 = arith.constant 0 : index
    %255 = vector.load %arg2[%c5, %c0_38] : memref<49x64xf32, #tpu.memory_space<vmem>>, vector<1x64xf32>
    %256 = vector.shape_cast %255 : vector<1x64xf32> to vector<64xf32>
    %257 = vector.shape_cast %256 : vector<64xf32> to vector<1x64xf32>
    %258 = vector.broadcast %257 : vector<1x64xf32> to vector<16x64xf32>
    %259 = arith.mulf %254, %258 : vector<16x64xf32>
    %260 = arith.addf %252, %259 : vector<16x64xf32>
    %261 = vector.extract_strided_slice %253 {offsets = [1, 0], sizes = [16, 64], strides = [1, 1]} : vector<22x64xf32> to vector<16x64xf32>
    %c12 = arith.constant 12 : index
    %c0_39 = arith.constant 0 : index
    %262 = vector.load %arg2[%c12, %c0_39] : memref<49x64xf32, #tpu.memory_space<vmem>>, vector<1x64xf32>
    %263 = vector.shape_cast %262 : vector<1x64xf32> to vector<64xf32>
    %264 = vector.shape_cast %263 : vector<64xf32> to vector<1x64xf32>
    %265 = vector.broadcast %264 : vector<1x64xf32> to vector<16x64xf32>
    %266 = arith.mulf %261, %265 : vector<16x64xf32>
    %267 = arith.addf %260, %266 : vector<16x64xf32>
    %268 = vector.extract_strided_slice %253 {offsets = [2, 0], sizes = [16, 64], strides = [1, 1]} : vector<22x64xf32> to vector<16x64xf32>
    %c19 = arith.constant 19 : index
    %c0_40 = arith.constant 0 : index
    %269 = vector.load %arg2[%c19, %c0_40] : memref<49x64xf32, #tpu.memory_space<vmem>>, vector<1x64xf32>
    %270 = vector.shape_cast %269 : vector<1x64xf32> to vector<64xf32>
    %271 = vector.shape_cast %270 : vector<64xf32> to vector<1x64xf32>
    %272 = vector.broadcast %271 : vector<1x64xf32> to vector<16x64xf32>
    %273 = arith.mulf %268, %272 : vector<16x64xf32>
    %274 = arith.addf %267, %273 : vector<16x64xf32>
    %275 = vector.extract_strided_slice %253 {offsets = [3, 0], sizes = [16, 64], strides = [1, 1]} : vector<22x64xf32> to vector<16x64xf32>
    %c26 = arith.constant 26 : index
    %c0_41 = arith.constant 0 : index
    %276 = vector.load %arg2[%c26, %c0_41] : memref<49x64xf32, #tpu.memory_space<vmem>>, vector<1x64xf32>
    %277 = vector.shape_cast %276 : vector<1x64xf32> to vector<64xf32>
    %278 = vector.shape_cast %277 : vector<64xf32> to vector<1x64xf32>
    %279 = vector.broadcast %278 : vector<1x64xf32> to vector<16x64xf32>
    %280 = arith.mulf %275, %279 : vector<16x64xf32>
    %281 = arith.addf %274, %280 : vector<16x64xf32>
    %282 = vector.extract_strided_slice %253 {offsets = [4, 0], sizes = [16, 64], strides = [1, 1]} : vector<22x64xf32> to vector<16x64xf32>
    %c33 = arith.constant 33 : index
    %c0_42 = arith.constant 0 : index
    %283 = vector.load %arg2[%c33, %c0_42] : memref<49x64xf32, #tpu.memory_space<vmem>>, vector<1x64xf32>
    %284 = vector.shape_cast %283 : vector<1x64xf32> to vector<64xf32>
    %285 = vector.shape_cast %284 : vector<64xf32> to vector<1x64xf32>
    %286 = vector.broadcast %285 : vector<1x64xf32> to vector<16x64xf32>
    %287 = arith.mulf %282, %286 : vector<16x64xf32>
    %288 = arith.addf %281, %287 : vector<16x64xf32>
    %289 = vector.extract_strided_slice %253 {offsets = [5, 0], sizes = [16, 64], strides = [1, 1]} : vector<22x64xf32> to vector<16x64xf32>
    %c40 = arith.constant 40 : index
    %c0_43 = arith.constant 0 : index
    %290 = vector.load %arg2[%c40, %c0_43] : memref<49x64xf32, #tpu.memory_space<vmem>>, vector<1x64xf32>
    %291 = vector.shape_cast %290 : vector<1x64xf32> to vector<64xf32>
    %292 = vector.shape_cast %291 : vector<64xf32> to vector<1x64xf32>
    %293 = vector.broadcast %292 : vector<1x64xf32> to vector<16x64xf32>
    %294 = arith.mulf %289, %293 : vector<16x64xf32>
    %295 = arith.addf %288, %294 : vector<16x64xf32>
    %296 = vector.extract_strided_slice %253 {offsets = [6, 0], sizes = [16, 64], strides = [1, 1]} : vector<22x64xf32> to vector<16x64xf32>
    %c47 = arith.constant 47 : index
    %c0_44 = arith.constant 0 : index
    %297 = vector.load %arg2[%c47, %c0_44] : memref<49x64xf32, #tpu.memory_space<vmem>>, vector<1x64xf32>
    %298 = vector.shape_cast %297 : vector<1x64xf32> to vector<64xf32>
    %299 = vector.shape_cast %298 : vector<64xf32> to vector<1x64xf32>
    %300 = vector.broadcast %299 : vector<1x64xf32> to vector<16x64xf32>
    %301 = arith.mulf %296, %300 : vector<16x64xf32>
    %302 = arith.addf %295, %301 : vector<16x64xf32>
    %303 = vector.extract_strided_slice %1 {offsets = [0, 24], sizes = [22, 64], strides = [1, 1]} : vector<22x128xf32> to vector<22x64xf32>
    %304 = vector.extract_strided_slice %303 {offsets = [0, 0], sizes = [16, 64], strides = [1, 1]} : vector<22x64xf32> to vector<16x64xf32>
    %c6 = arith.constant 6 : index
    %c0_45 = arith.constant 0 : index
    %305 = vector.load %arg2[%c6, %c0_45] : memref<49x64xf32, #tpu.memory_space<vmem>>, vector<1x64xf32>
    %306 = vector.shape_cast %305 : vector<1x64xf32> to vector<64xf32>
    %307 = vector.shape_cast %306 : vector<64xf32> to vector<1x64xf32>
    %308 = vector.broadcast %307 : vector<1x64xf32> to vector<16x64xf32>
    %309 = arith.mulf %304, %308 : vector<16x64xf32>
    %310 = arith.addf %302, %309 : vector<16x64xf32>
    %311 = vector.extract_strided_slice %303 {offsets = [1, 0], sizes = [16, 64], strides = [1, 1]} : vector<22x64xf32> to vector<16x64xf32>
    %c13 = arith.constant 13 : index
    %c0_46 = arith.constant 0 : index
    %312 = vector.load %arg2[%c13, %c0_46] : memref<49x64xf32, #tpu.memory_space<vmem>>, vector<1x64xf32>
    %313 = vector.shape_cast %312 : vector<1x64xf32> to vector<64xf32>
    %314 = vector.shape_cast %313 : vector<64xf32> to vector<1x64xf32>
    %315 = vector.broadcast %314 : vector<1x64xf32> to vector<16x64xf32>
    %316 = arith.mulf %311, %315 : vector<16x64xf32>
    %317 = arith.addf %310, %316 : vector<16x64xf32>
    %318 = vector.extract_strided_slice %303 {offsets = [2, 0], sizes = [16, 64], strides = [1, 1]} : vector<22x64xf32> to vector<16x64xf32>
    %c20 = arith.constant 20 : index
    %c0_47 = arith.constant 0 : index
    %319 = vector.load %arg2[%c20, %c0_47] : memref<49x64xf32, #tpu.memory_space<vmem>>, vector<1x64xf32>
    %320 = vector.shape_cast %319 : vector<1x64xf32> to vector<64xf32>
    %321 = vector.shape_cast %320 : vector<64xf32> to vector<1x64xf32>
    %322 = vector.broadcast %321 : vector<1x64xf32> to vector<16x64xf32>
    %323 = arith.mulf %318, %322 : vector<16x64xf32>
    %324 = arith.addf %317, %323 : vector<16x64xf32>
    %325 = vector.extract_strided_slice %303 {offsets = [3, 0], sizes = [16, 64], strides = [1, 1]} : vector<22x64xf32> to vector<16x64xf32>
    %c27 = arith.constant 27 : index
    %c0_48 = arith.constant 0 : index
    %326 = vector.load %arg2[%c27, %c0_48] : memref<49x64xf32, #tpu.memory_space<vmem>>, vector<1x64xf32>
    %327 = vector.shape_cast %326 : vector<1x64xf32> to vector<64xf32>
    %328 = vector.shape_cast %327 : vector<64xf32> to vector<1x64xf32>
    %329 = vector.broadcast %328 : vector<1x64xf32> to vector<16x64xf32>
    %330 = arith.mulf %325, %329 : vector<16x64xf32>
    %331 = arith.addf %324, %330 : vector<16x64xf32>
    %332 = vector.extract_strided_slice %303 {offsets = [4, 0], sizes = [16, 64], strides = [1, 1]} : vector<22x64xf32> to vector<16x64xf32>
    %c34 = arith.constant 34 : index
    %c0_49 = arith.constant 0 : index
    %333 = vector.load %arg2[%c34, %c0_49] : memref<49x64xf32, #tpu.memory_space<vmem>>, vector<1x64xf32>
    %334 = vector.shape_cast %333 : vector<1x64xf32> to vector<64xf32>
    %335 = vector.shape_cast %334 : vector<64xf32> to vector<1x64xf32>
    %336 = vector.broadcast %335 : vector<1x64xf32> to vector<16x64xf32>
    %337 = arith.mulf %332, %336 : vector<16x64xf32>
    %338 = arith.addf %331, %337 : vector<16x64xf32>
    %339 = vector.extract_strided_slice %303 {offsets = [5, 0], sizes = [16, 64], strides = [1, 1]} : vector<22x64xf32> to vector<16x64xf32>
    %c41 = arith.constant 41 : index
    %c0_50 = arith.constant 0 : index
    %340 = vector.load %arg2[%c41, %c0_50] : memref<49x64xf32, #tpu.memory_space<vmem>>, vector<1x64xf32>
    %341 = vector.shape_cast %340 : vector<1x64xf32> to vector<64xf32>
    %342 = vector.shape_cast %341 : vector<64xf32> to vector<1x64xf32>
    %343 = vector.broadcast %342 : vector<1x64xf32> to vector<16x64xf32>
    %344 = arith.mulf %339, %343 : vector<16x64xf32>
    %345 = arith.addf %338, %344 : vector<16x64xf32>
    %346 = vector.extract_strided_slice %303 {offsets = [6, 0], sizes = [16, 64], strides = [1, 1]} : vector<22x64xf32> to vector<16x64xf32>
    %c48 = arith.constant 48 : index
    %c0_51 = arith.constant 0 : index
    %347 = vector.load %arg2[%c48, %c0_51] : memref<49x64xf32, #tpu.memory_space<vmem>>, vector<1x64xf32>
    %348 = vector.shape_cast %347 : vector<1x64xf32> to vector<64xf32>
    %349 = vector.shape_cast %348 : vector<64xf32> to vector<1x64xf32>
    %350 = vector.broadcast %349 : vector<1x64xf32> to vector<16x64xf32>
    %351 = arith.mulf %346, %350 : vector<16x64xf32>
    %352 = arith.addf %345, %351 : vector<16x64xf32>
    %c0_52 = arith.constant 0 : index
    %c0_53 = arith.constant 0 : index
    %353 = vector.load %arg3[%c0_52, %c0_53] : memref<64x128xf32, #tpu.memory_space<vmem>>, vector<64x128xf32>
    %cst_54 = arith.constant dense<0.000000e+00> : vector<16x128xf32>
    %354 = tpu.matmul %352, %353, %cst_54 {dimension_numbers = #tpu.dot_dimension_numbers<[1], [0], [0], [1], [0, 0, 1, 1], [], []>} : vector<16x64xf32>, vector<64x128xf32>, vector<16x128xf32> -> vector<16x128xf32>
    %c0_55 = arith.constant 0 : index
    %c0_56 = arith.constant 0 : index
    %c0_57 = arith.constant 0 : index
    %355 = vector.load %arg4[%c0_55, %c0_56, %c0_57] : memref<1x16x128xf32, #tpu.memory_space<vmem>>, vector<1x16x128xf32>
    %356 = vector.shape_cast %355 : vector<1x16x128xf32> to vector<16x128xf32>
    %357 = vector.shape_cast %354 : vector<16x128xf32> to vector<1x16x128xf32>
    tpu.vector_store %arg4[%c0_55, %c0_56, %c0_57], %357 {strides = array<i32>} : memref<1x16x128xf32, #tpu.memory_space<vmem>>, vector<1x16x128xf32>,
    %cst_58 = arith.constant dense<0.000000e+00> : vector<128xf32>
    %358 = vector.multi_reduction <add>, %354, %cst_58 [0] : vector<16x128xf32> to vector<128xf32>
    %359 = vector.shape_cast %358 : vector<128xf32> to vector<1x128xf32>
    %c0_59 = arith.constant 0 : index
    %c0_60 = arith.constant 0 : index
    %c0_61 = arith.constant 0 : index
    %360 = vector.load %arg5[%c0_59, %c0_60, %c0_61] : memref<1x2x128xf32, #tpu.memory_space<vmem>>, vector<1x1x128xf32>
    %361 = vector.shape_cast %360 : vector<1x1x128xf32> to vector<1x128xf32>
    %362 = vector.shape_cast %359 : vector<1x128xf32> to vector<1x1x128xf32>
    tpu.vector_store %arg5[%c0_59, %c0_60, %c0_61], %362 {strides = array<i32>} : memref<1x2x128xf32, #tpu.memory_space<vmem>>, vector<1x1x128xf32>,
    %363 = arith.mulf %354, %354 : vector<16x128xf32>
    %cst_62 = arith.constant dense<0.000000e+00> : vector<128xf32>
    %364 = vector.multi_reduction <add>, %363, %cst_62 [0] : vector<16x128xf32> to vector<128xf32>
    %365 = vector.shape_cast %364 : vector<128xf32> to vector<1x128xf32>
    %c0_63 = arith.constant 0 : index
    %c1_64 = arith.constant 1 : index
    %c0_65 = arith.constant 0 : index
    %366 = vector.load %arg5[%c0_63, %c1_64, %c0_65] : memref<1x2x128xf32, #tpu.memory_space<vmem>>, vector<1x1x128xf32>
    %367 = vector.shape_cast %366 : vector<1x1x128xf32> to vector<1x128xf32>
    %368 = vector.shape_cast %365 : vector<1x128xf32> to vector<1x1x128xf32>
    tpu.vector_store %arg5[%c0_63, %c1_64, %c0_65], %368 {strides = array<i32>} : memref<1x2x128xf32, #tpu.memory_space<vmem>>, vector<1x1x128xf32>,
    return
  }
  func.func @transform_0(%arg0: i32) -> (i32, i32, i32) {
    %c0_i32 = arith.constant 0 : i32
    %c0_i32_0 = arith.constant 0 : i32
    %c0_i32_1 = arith.constant 0 : i32
    return %arg0, %c0_i32, %c0_i32_0 : i32, i32, i32
  }
  func.func @transform_1(%arg0: i32) -> (i32, i32) {
    %c0_i32 = arith.constant 0 : i32
    %c0_i32_0 = arith.constant 0 : i32
    %c0_i32_1 = arith.constant 0 : i32
    return %c0_i32, %c0_i32_0 : i32, i32
  }
  func.func @transform_2(%arg0: i32) -> (i32, i32) {
    %c0_i32 = arith.constant 0 : i32
    %c0_i32_0 = arith.constant 0 : i32
    %c0_i32_1 = arith.constant 0 : i32
    return %c0_i32, %c0_i32_0 : i32, i32
  }
  func.func @transform_3(%arg0: i32) -> (i32, i32, i32) {
    %c0_i32 = arith.constant 0 : i32
    %c0_i32_0 = arith.constant 0 : i32
    %c0_i32_1 = arith.constant 0 : i32
    return %arg0, %c0_i32, %c0_i32_0 : i32, i32, i32
  }
  func.func @transform_4(%arg0: i32) -> (i32, i32, i32) {
    %c0_i32 = arith.constant 0 : i32
    %c0_i32_0 = arith.constant 0 : i32
    %c0_i32_1 = arith.constant 0 : i32
    return %arg0, %c0_i32, %c0_i32_0 : i32, i32, i32
  }
}

module attributes {stable_mosaic.version = 11 : i64} {
  func.func @_bn_silu_kernel(%arg0: i32, %arg1: memref<32x128xf32, #tpu.memory_space<vmem>>, %arg2: memref<1x128xf32, #tpu.memory_space<vmem>>, %arg3: memref<1x128xf32, #tpu.memory_space<vmem>>, %arg4: memref<32x128xf32, #tpu.memory_space<vmem>>) attributes {dimension_semantics = [#tpu.dimension_semantics<arbitrary>], iteration_bounds = array<i64: 1>, scalar_prefetch = 0 : i64, scratch_operands = 0 : i64, tpu.core_type = #tpu.core_type<tc>, window_params = [{pipeline_mode = #tpu.pipeline_mode<synchronous>, transform_indices = @transform_0, window_bounds = array<i64: 32, 128>}, {pipeline_mode = #tpu.pipeline_mode<synchronous>, transform_indices = @transform_1, window_bounds = array<i64: 1, 128>}, {pipeline_mode = #tpu.pipeline_mode<synchronous>, transform_indices = @transform_2, window_bounds = array<i64: 1, 128>}, {pipeline_mode = #tpu.pipeline_mode<synchronous>, transform_indices = @transform_3, window_bounds = array<i64: 32, 128>}]} {
    %c0 = arith.constant 0 : index
    %c0_0 = arith.constant 0 : index
    %0 = vector.load %arg1[%c0, %c0_0] : memref<32x128xf32, #tpu.memory_space<vmem>>, vector<32x128xf32>
    %c0_1 = arith.constant 0 : index
    %c0_2 = arith.constant 0 : index
    %1 = vector.load %arg2[%c0_1, %c0_2] : memref<1x128xf32, #tpu.memory_space<vmem>>, vector<1x128xf32>
    %2 = vector.broadcast %1 : vector<1x128xf32> to vector<32x128xf32>
    %3 = arith.mulf %0, %2 : vector<32x128xf32>
    %c0_3 = arith.constant 0 : index
    %c0_4 = arith.constant 0 : index
    %4 = vector.load %arg3[%c0_3, %c0_4] : memref<1x128xf32, #tpu.memory_space<vmem>>, vector<1x128xf32>
    %5 = vector.broadcast %4 : vector<1x128xf32> to vector<32x128xf32>
    %6 = arith.addf %3, %5 : vector<32x128xf32>
    %cst = arith.constant 0.000000e+00 : f32
    %7 = vector.broadcast %cst : f32 to vector<32x128xf32>
    %8 = arith.subf %7, %6 : vector<32x128xf32>
    %9 = math.exp %8 : vector<32x128xf32>
    %cst_5 = arith.constant 1.000000e+00 : f32
    %10 = vector.broadcast %cst_5 : f32 to vector<32x128xf32>
    %11 = arith.addf %10, %9 : vector<32x128xf32>
    %cst_6 = arith.constant 1.000000e+00 : f32
    %12 = vector.broadcast %cst_6 : f32 to vector<32x128xf32>
    %13 = arith.divf %12, %11 : vector<32x128xf32>
    %14 = arith.mulf %6, %13 : vector<32x128xf32>
    %c0_7 = arith.constant 0 : index
    %c0_8 = arith.constant 0 : index
    %15 = vector.load %arg4[%c0_7, %c0_8] : memref<32x128xf32, #tpu.memory_space<vmem>>, vector<32x128xf32>
    tpu.vector_store %arg4[%c0_7, %c0_8], %14 {strides = array<i32>} : memref<32x128xf32, #tpu.memory_space<vmem>>, vector<32x128xf32>,
    return
  }
  func.func @transform_0(%arg0: i32) -> (i32, i32) {
    %c0_i32 = arith.constant 0 : i32
    %c0_i32_0 = arith.constant 0 : i32
    %c0_i32_1 = arith.constant 0 : i32
    return %c0_i32, %c0_i32_0 : i32, i32
  }
  func.func @transform_1(%arg0: i32) -> (i32, i32) {
    %c0_i32 = arith.constant 0 : i32
    %c0_i32_0 = arith.constant 0 : i32
    %c0_i32_1 = arith.constant 0 : i32
    return %c0_i32, %c0_i32_0 : i32, i32
  }
  func.func @transform_2(%arg0: i32) -> (i32, i32) {
    %c0_i32 = arith.constant 0 : i32
    %c0_i32_0 = arith.constant 0 : i32
    %c0_i32_1 = arith.constant 0 : i32
    return %c0_i32, %c0_i32_0 : i32, i32
  }
  func.func @transform_3(%arg0: i32) -> (i32, i32) {
    %c0_i32 = arith.constant 0 : i32
    %c0_i32_0 = arith.constant 0 : i32
    %c0_i32_1 = arith.constant 0 : i32
    return %c0_i32, %c0_i32_0 : i32, i32
  }
}

</mosaic_0001>

<bundles_post_ra>
// kernel: tile.19
= control target key start
LH: loop header
LB: loop body
LE: loop exit
PB: predicated region body
PF: predicated region fallthrough
CT: control target
= control target key end

     0   :  { %vm4_vm0 = vcmask 1047556   ;;  %s758_s14 = smov 42   ;;  %s759_s26 = smov 35   ;;  %vm6_vm1 = vcmask 56320   ;;  %vm79_vm2 = vcmask 400720   ;;  %vm166_vm3 = vcmask 343320   ;;  %s1462_s0 = inlined_call_operand.vmem [shape: f32[7,1,7,16,4], index: 0, kind: input, shape index: {}]   ;;  %s1463_s1 = inlined_call_operand.vmem [shape: f32[49,64], index: 1, kind: output, shape index: {}]  }
   0x1   :  { %v619_v0 = vld [vmem:[%s1462_s0 + $0x46] ss:$8 sm:$0xf]   ;;  %v639_v24 = vld [vmem:[%s1462_s0 + $0x105] ss:$8 sm:$0xf]  }
   0x2   :  { %v620_v1 = vld [vmem:[%s1462_s0 + $0x46] ss:$8 sm:$0xf0]   ;;  %v640_v25 = vld [vmem:[%s1462_s0 + $0x105] ss:$8 sm:$0xf0]  }
   0x3   :  { %v97_v2 = vsel %vm4_vm0, %v620_v1, %v619_v0  ;;  %v614_v3 = vld [vmem:[%s1462_s0 + $0x6] ss:$8 sm:$0xf]   ;;  %v637_v26 = vld [vmem:[%s1462_s0 + $0x5] ss:$8 sm:$0xf]   ;;  %v173_v28 = vsel %vm4_vm0, %v640_v25, %v639_v24 }
   0x4   :  { %v615_v4 = vld [vmem:[%s1462_s0 + $0x6] ss:$8 sm:$0xf0]   ;;  %98 = vrot.lane.b32.xlu1 %v97_v2, %s758_s14  ;;  %v638_v27 = vld [vmem:[%s1462_s0 + $0x5] ss:$8 sm:$0xf0]  }
   0x5   :  { %v76_v5 = vsel %vm4_vm0, %v615_v4, %v614_v3  ;;  %v622_v6 = vld [vmem:[%s1462_s0 + $0x146] ss:$8 sm:$0xf]   ;;  %v163_v29 = vsel %vm4_vm0, %v638_v27, %v637_v26  ;;  %v645_v30 = vld [vmem:[%s1462_s0 + $0x145] ss:$8 sm:$0xf]  }
   0x6   :  { %v623_v7 = vld [vmem:[%s1462_s0 + $0x146] ss:$8 sm:$0xf0]   ;;  %77 = vrot.lane.b32.xlu0 %v76_v5, %s758_s14  ;;  %v646_v31 = vld [vmem:[%s1462_s0 + $0x145] ss:$8 sm:$0xf0]  }
   0x7   :  { %v108_v8 = vsel %vm4_vm0, %v623_v7, %v622_v6  ;;  %v616_v9 = vld [vmem:[%s1462_s0 + $0x106] ss:$8 sm:$0xf]   ;;  %v642_v32 = vld [vmem:[%s1462_s0 + $0x45] ss:$8 sm:$0xf]   ;;  %v195_v34 = vsel %vm4_vm0, %v646_v31, %v645_v30 }
   0x8   :  { %v617_v10 = vld [vmem:[%s1462_s0 + $0x106] ss:$8 sm:$0xf0]   ;;  %109 = vrot.lane.b32.xlu1 %v108_v8, %s758_s14  ;;  %v643_v33 = vld [vmem:[%s1462_s0 + $0x45] ss:$8 sm:$0xf0]  }
   0x9   :  { %v86_v11 = vsel %vm4_vm0, %v617_v10, %v616_v9  ;;  %v628_v12 = vld [vmem:[%s1462_s0 + $0x186] ss:$8 sm:$0xf]   ;;  %v184_v35 = vsel %vm4_vm0, %v643_v33, %v642_v32  ;;  %v651_v36 = vld [vmem:[%s1462_s0 + $0x185] ss:$8 sm:$0xf]  }
   0xa   :  { %v629_v13 = vld [vmem:[%s1462_s0 + $0x186] ss:$8 sm:$0xf0]   ;;  %87 = vrot.lane.b32.xlu0 %v86_v11, %s758_s14  ;;  %v652_v37 = vld [vmem:[%s1462_s0 + $0x185] ss:$8 sm:$0xf0]  }
   0xb   :  { %v625_v14 = vld [vmem:[%s1462_s0 + $0x86] ss:$8 sm:$0xf]   ;;  %v130_v16 = vsel %vm4_vm0, %v629_v13, %v628_v12  ;;  %v648_v38 = vld [vmem:[%s1462_s0 + $0x85] ss:$8 sm:$0xf]   ;;  %v217_v40 = vsel %vm4_vm0, %v652_v37, %v651_v36 }
   0xc   :  { %v626_v15 = vld [vmem:[%s1462_s0 + $0x86] ss:$8 sm:$0xf0]   ;;  %131 = vrot.lane.b32.xlu1 %v130_v16, %s758_s14  ;;  %v649_v39 = vld [vmem:[%s1462_s0 + $0x85] ss:$8 sm:$0xf0]  }
   0xd   :  { %v119_v17 = vsel %vm4_vm0, %v626_v15, %v625_v14  ;;  %v634_v18 = vld [vmem:[%s1462_s0 + $0x1c6] ss:$8 sm:$0xf]   ;;  %v206_v41 = vsel %vm4_vm0, %v649_v39, %v648_v38  ;;  %v657_v42 = vld [vmem:[%s1462_s0 + $0x1c5] ss:$8 sm:$0xf]  }
   0xe   :  { %v635_v19 = vld [vmem:[%s1462_s0 + $0x1c6] ss:$8 sm:$0xf0]   ;;  %120 = vrot.lane.b32.xlu0 %v119_v17, %s758_s14  ;;  %v658_v43 = vld [vmem:[%s1462_s0 + $0x1c5] ss:$8 sm:$0xf0]  }
   0xf   :  { %v631_v20 = vld [vmem:[%s1462_s0 + $0xc6] ss:$8 sm:$0xf]   ;;  %v152_v22 = vsel %vm4_vm0, %v635_v19, %v634_v18  ;;  %v654_v44 = vld [vmem:[%s1462_s0 + $0xc5] ss:$8 sm:$0xf]   ;;  %v239_v46 = vsel %vm4_vm0, %v658_v43, %v657_v42 }
  0x10   :  { %v632_v21 = vld [vmem:[%s1462_s0 + $0xc6] ss:$8 sm:$0xf0]   ;;  %153 = vrot.lane.b32.xlu1 %v152_v22, %s758_s14  ;;  %v655_v45 = vld [vmem:[%s1462_s0 + $0xc5] ss:$8 sm:$0xf0]  }
  0x11   :  { %v141_v23 = vsel %vm4_vm0, %v632_v21, %v631_v20  ;;  %v228_v47 = vsel %vm4_vm0, %v655_v45, %v654_v44  ;;  %v662_v48 = vld [vmem:[%s1462_s0 + $0x104] ss:$8 sm:$0xf]   ;;  %v708_v58 = vld [vmem:[%s1462_s0 + $0x102] ss:$8 sm:$0xf]  }
  0x12   :  { %142 = vrot.lane.b32.xlu0 %v141_v23, %s758_s14  ;;  %v663_v49 = vld [vmem:[%s1462_s0 + $0x104] ss:$8 sm:$0xf0]   ;;  %v709_v59 = vld [vmem:[%s1462_s0 + $0x102] ss:$8 sm:$0xf0]  }
  0x13   :  { %v660_v50 = vld [vmem:[%s1462_s0 + $0x4] ss:$8 sm:$0xf]   ;;  %v260_v52 = vsel %vm4_vm0, %v663_v49, %v662_v48  ;;  %s760_s5 = smov 28   ;;  %v934_v62 = vsel %vm4_vm0, %v709_v59, %v708_v58  ;;  %s761_s18 = smov 21   ;;  %vm253_vm4 = vcmask 285920  }
  0x14   :  { %174 = vrot.lane.b32.xlu1 %v173_v28, %s759_s26  ;;  %v661_v51 = vld [vmem:[%s1462_s0 + $0x4] ss:$8 sm:$0xf0]   ;;  %v706_v63 = vld [vmem:[%s1462_s0 + $0x2] ss:$8 sm:$0xf]  }
  0x15   :  { %v668_v53 = vld [vmem:[%s1462_s0 + $0x144] ss:$8 sm:$0xf]   ;;  %v250_v55 = vsel %vm4_vm0, %v661_v51, %v660_v50  ;;  %v707_v0 = vld [vmem:[%s1462_s0 + $0x2] ss:$8 sm:$0xf0]  }
  0x16   :  { %164 = vrot.lane.b32.xlu0 %v163_v29, %s759_s26  ;;  %v669_v54 = vld [vmem:[%s1462_s0 + $0x144] ss:$8 sm:$0xf0]   ;;  %v951_v4 = vsel %vm4_vm0, %v707_v0, %v706_v63  ;;  %v714_v5 = vld [vmem:[%s1462_s0 + $0x142] ss:$8 sm:$0xf]  }
  0x17   :  { %v665_v56 = vld [vmem:[%s1462_s0 + $0x44] ss:$8 sm:$0xf]   ;;  %v282_v1 = vsel %vm4_vm0, %v669_v54, %v668_v53  ;;  %v715_v6 = vld [vmem:[%s1462_s0 + $0x142] ss:$8 sm:$0xf0]  }
  0x18   :  { %196 = vrot.lane.b32.xlu1 %v195_v34, %s759_s26  ;;  %v666_v57 = vld [vmem:[%s1462_s0 + $0x44] ss:$8 sm:$0xf0]   ;;  %v961_v8 = vsel %vm4_vm0, %v715_v6, %v714_v5  ;;  %v711_v9 = vld [vmem:[%s1462_s0 + $0x42] ss:$8 sm:$0xf]  }
  0x19   :  { %v674_v60 = vld [vmem:[%s1462_s0 + $0x184] ss:$8 sm:$0xf]   ;;  %v271_v7 = vsel %vm4_vm0, %v666_v57, %v665_v56  ;;  %v712_v10 = vld [vmem:[%s1462_s0 + $0x42] ss:$8 sm:$0xf0]  }
  0x1a   :  { %185 = vrot.lane.b32.xlu0 %v184_v35, %s759_s26  ;;  %v675_v61 = vld [vmem:[%s1462_s0 + $0x184] ss:$8 sm:$0xf0]   ;;  %v970_v11 = vsel %vm4_vm0, %v712_v10, %v711_v9  ;;  %v720_v12 = vld [vmem:[%s1462_s0 + $0x182] ss:$8 sm:$0xf]  }
  0x1b   :  { %v671_v2 = vld [vmem:[%s1462_s0 + $0x84] ss:$8 sm:$0xf]   ;;  %v721_v13 = vld [vmem:[%s1462_s0 + $0x182] ss:$8 sm:$0xf0]   ;;  %v304_v19 = vsel %vm4_vm0, %v675_v61, %v674_v60 }
  0x1c   :  { %218 = vrot.lane.b32.xlu1 %v217_v40, %s759_s26  ;;  %v672_v3 = vld [vmem:[%s1462_s0 + $0x84] ss:$8 sm:$0xf0]   ;;  %v986_v16 = vsel %vm4_vm0, %v721_v13, %v720_v12  ;;  %v717_v17 = vld [vmem:[%s1462_s0 + $0x82] ss:$8 sm:$0xf]  }
  0x1d   :  { %v680_v14 = vld [vmem:[%s1462_s0 + $0x1c4] ss:$8 sm:$0xf]   ;;  %v718_v18 = vld [vmem:[%s1462_s0 + $0x82] ss:$8 sm:$0xf0]   ;;  %v293_v25 = vsel %vm4_vm0, %v672_v3, %v671_v2 }
  0x1e   :  { %207 = vrot.lane.b32.xlu0 %v206_v41, %s759_s26  ;;  %v681_v15 = vld [vmem:[%s1462_s0 + $0x1c4] ss:$8 sm:$0xf0]   ;;  %v1003_v22 = vsel %vm4_vm0, %v718_v18, %v717_v17  ;;  %v726_v23 = vld [vmem:[%s1462_s0 + $0x1c2] ss:$8 sm:$0xf]  }
  0x1f   :  { %v677_v20 = vld [vmem:[%s1462_s0 + $0xc4] ss:$8 sm:$0xf]   ;;  %v727_v24 = vld [vmem:[%s1462_s0 + $0x1c2] ss:$8 sm:$0xf0]   ;;  %v326_v37 = vsel %vm4_vm0, %v681_v15, %v680_v14 }
  0x20   :  { %240 = vrot.lane.b32.xlu1 %v239_v46, %s759_s26  ;;  %v678_v21 = vld [vmem:[%s1462_s0 + $0xc4] ss:$8 sm:$0xf0]   ;;  %v1013_v26 = vsel %vm4_vm0, %v727_v24, %v726_v23  ;;  %v723_v27 = vld [vmem:[%s1462_s0 + $0xc2] ss:$8 sm:$0xf]  }
  0x21   :  { %v724_v28 = vld [vmem:[%s1462_s0 + $0xc2] ss:$8 sm:$0xf0]   ;;  %v731_v30 = vld [vmem:[%s1462_s0 + $0x101] ss:$8 sm:$0xf]   ;;  %v315_v43 = vsel %vm4_vm0, %v678_v21, %v677_v20 }
  0x22   :  { %229 = vrot.lane.b32.xlu0 %v228_v47, %s759_s26  ;;  %v1022_v29 = vsel %vm4_vm0, %v724_v28, %v723_v27  ;;  %v732_v31 = vld [vmem:[%s1462_s0 + $0x101] ss:$8 sm:$0xf0]   ;;  %v685_v32 = vld [vmem:[%s1462_s0 + $0x103] ss:$8 sm:$0xf]  }
  0x23   :  { %v686_v33 = vld [vmem:[%s1462_s0 + $0x103] ss:$8 sm:$0xf0]   ;;  %v1038_v34 = vsel %vm4_vm0, %v732_v31, %v731_v30  ;;  %v729_v35 = vld [vmem:[%s1462_s0 + $0x1] ss:$8 sm:$0xf]  }
  0x24   :  { %261 = vrot.lane.b32.xlu1 %v260_v52, %s760_s5  ;;  %v730_v36 = vld [vmem:[%s1462_s0 + $0x1] ss:$8 sm:$0xf0]   ;;  %v683_v38 = vld [vmem:[%s1462_s0 + $0x3] ss:$8 sm:$0xf]  }
  0x25   :  { %v684_v39 = vld [vmem:[%s1462_s0 + $0x3] ss:$8 sm:$0xf0]   ;;  %v1055_v40 = vsel %vm4_vm0, %v730_v36, %v729_v35  ;;  %v737_v41 = vld [vmem:[%s1462_s0 + $0x141] ss:$8 sm:$0xf]  }
  0x26   :  { %251 = vrot.lane.b32.xlu0 %v250_v55, %s760_s5  ;;  %v738_v42 = vld [vmem:[%s1462_s0 + $0x141] ss:$8 sm:$0xf0]   ;;  %v691_v50 = vld [vmem:[%s1462_s0 + $0x143] ss:$8 sm:$0xf]   ;;  %v347_v55 = vsel %vm4_vm0, %v686_v33, %v685_v32  ;;  %v337_v61 = vsel %vm4_vm0, %v684_v39, %v683_v38 }
  0x27   :  { %v1065_v44 = vsel %vm4_vm0, %v738_v42, %v737_v41  ;;  %v734_v45 = vld [vmem:[%s1462_s0 + $0x41] ss:$8 sm:$0xf]   ;;  %v692_v51 = vld [vmem:[%s1462_s0 + $0x143] ss:$8 sm:$0xf0]  }
  0x28   :  { %283 = vrot.lane.b32.xlu1 %v282_v1, %s760_s5  ;;  %v735_v46 = vld [vmem:[%s1462_s0 + $0x41] ss:$8 sm:$0xf0]   ;;  %v688_v56 = vld [vmem:[%s1462_s0 + $0x43] ss:$8 sm:$0xf]   ;;  %v369_v13 = vsel %vm4_vm0, %v692_v51, %v691_v50 }
  0x29   :  { %v1074_v47 = vsel %vm4_vm0, %v735_v46, %v734_v45  ;;  %v743_v48 = vld [vmem:[%s1462_s0 + $0x181] ss:$8 sm:$0xf]   ;;  %v689_v57 = vld [vmem:[%s1462_s0 + $0x43] ss:$8 sm:$0xf0]  }
  0x2a   :  { %272 = vrot.lane.b32.xlu0 %v271_v7, %s760_s5  ;;  %v744_v49 = vld [vmem:[%s1462_s0 + $0x181] ss:$8 sm:$0xf0]   ;;  %v593_v3 = vld [vmem:[%s1462_s0 + $0x40] ss:$8 sm:$0xf]   ;;  %v358_v20 = vsel %vm4_vm0, %v689_v57, %v688_v56 }
  0x2b   :  { %v1090_v52 = vsel %vm4_vm0, %v744_v49, %v743_v48  ;;  %v740_v53 = vld [vmem:[%s1462_s0 + $0x81] ss:$8 sm:$0xf]   ;;  %v594_v5 = vld [vmem:[%s1462_s0 + $0x40] ss:$8 sm:$0xf0]  }
  0x2c   :  { %305 = vrot.lane.b32.xlu1 %v304_v19, %s760_s5  ;;  %v741_v54 = vld [vmem:[%s1462_s0 + $0x81] ss:$8 sm:$0xf0]   ;;  %v697_v6 = vld [vmem:[%s1462_s0 + $0x183] ss:$8 sm:$0xf]   ;;  %v13_v9 = vsel %vm4_vm0, %v594_v5, %v593_v3 }
  0x2d   :  { %v1107_v58 = vsel %vm4_vm0, %v741_v54, %v740_v53  ;;  %v749_v59 = vld [vmem:[%s1462_s0 + $0x1c1] ss:$8 sm:$0xf]   ;;  %v698_v7 = vld [vmem:[%s1462_s0 + $0x183] ss:$8 sm:$0xf0]  }
  0x2e   :  { %294 = vrot.lane.b32.xlu0 %v293_v25, %s760_s5  ;;  %v750_v60 = vld [vmem:[%s1462_s0 + $0x1c1] ss:$8 sm:$0xf0]   ;;  %v2_v10 = vld [vmem:[%s1462_s0] ss:$8 sm:$0xf]   ;;  %v391_v36 = vsel %vm4_vm0, %v698_v7, %v697_v6 }
  0x2f   :  { %v1117_v63 = vsel %vm4_vm0, %v750_v60, %v749_v59  ;;  %v746_v0 = vld [vmem:[%s1462_s0 + $0xc1] ss:$8 sm:$0xf]   ;;  %v3_v12 = vld [vmem:[%s1462_s0] ss:$8 sm:$0xf0]  }
  0x30   :  { %327 = vrot.lane.b32.xlu1 %v326_v37, %s760_s5  ;;  %v747_v1 = vld [vmem:[%s1462_s0 + $0xc1] ss:$8 sm:$0xf0]   ;;  %v694_v14 = vld [vmem:[%s1462_s0 + $0x83] ss:$8 sm:$0xf]   ;;  %v5_v17 = vsel %vm4_vm0, %v3_v12, %v2_v10 }
  0x31   :  { %v1126_v2 = vsel %vm4_vm0, %v747_v1, %v746_v0  ;;  %v695_v15 = vld [vmem:[%s1462_s0 + $0x83] ss:$8 sm:$0xf0]   ;;  %595 = vst.msk [vmem:[%s1463_s1 + $0x8] sm:$0xff] %vm6_vm1, %v13_v9   ;;  %7 = vst.msk [vmem:[%s1463_s1] sm:$0xff] %vm6_vm1, %v5_v17   ;;  %s763_s21 = smov 7  }
  0x32   :  { %316 = vrot.lane.b32.xlu0 %v315_v43, %s760_s5  ;;  %v605_v18 = vld [vmem:[%s1462_s0 + $0x140] ss:$8 sm:$0xf]   ;;  %v703_v30 = vld [vmem:[%s1462_s0 + $0x1c3] ss:$8 sm:$0xf]   ;;  %v380_v41 = vsel %vm4_vm0, %v695_v15, %v694_v14 }
  0x33   :  { %v606_v19 = vld [vmem:[%s1462_s0 + $0x140] ss:$8 sm:$0xf0]   ;;  %v704_v31 = vld [vmem:[%s1462_s0 + $0x1c3] ss:$8 sm:$0xf0]  }
  0x34   :  { %348 = vrot.lane.b32.xlu1 %v347_v55, %s761_s18  ;;  %v49_v21 = vsel %vm4_vm0, %v606_v19, %v605_v18  ;;  %v602_v23 = vld [vmem:[%s1462_s0 + $0x100] ss:$8 sm:$0xf]   ;;  %v700_v46 = vld [vmem:[%s1462_s0 + $0xc3] ss:$8 sm:$0xf]   ;;  %v413_v50 = vsel %vm4_vm0, %v704_v31, %v703_v30 }
  0x35   :  { %v603_v24 = vld [vmem:[%s1462_s0 + $0x100] ss:$8 sm:$0xf0]   ;;  %607 = vst.msk [vmem:[%s1463_s1 + $0x28] sm:$0xff] %vm6_vm1, %v49_v21   ;;  %vm340_vm5 = vcmask 228520   ;;  %vm427_vm6 = vcmask 171120  }
  0x36   :  { %338 = vrot.lane.b32.xlu0 %v337_v61, %s761_s18  ;;  %v40_v25 = vsel %vm4_vm0, %v603_v24, %v602_v23  ;;  %v608_v27 = vld [vmem:[%s1462_s0 + $0x180] ss:$8 sm:$0xf]   ;;  %v701_v48 = vld [vmem:[%s1462_s0 + $0xc3] ss:$8 sm:$0xf0]  }
  0x37   :  { %v609_v28 = vld [vmem:[%s1462_s0 + $0x180] ss:$8 sm:$0xf0]   ;;  %604 = vst.msk [vmem:[%s1463_s1 + $0x20] sm:$0xff] %vm6_vm1, %v40_v25   ;;  %v402_v51 = vsel %vm4_vm0, %v701_v48, %v700_v46  ;;  %vm514_vm7 = vcmask 113720  }
  0x38   :  { %370 = vrot.lane.b32.xlu1 %v369_v13, %s761_s18  ;;  %v58_v32 = vsel %vm4_vm0, %v609_v28, %v608_v27  ;;  %v596_v33 = vld [vmem:[%s1462_s0 + $0x80] ss:$8 sm:$0xf]  }
  0x39   :  { %v597_v35 = vld [vmem:[%s1462_s0 + $0x80] ss:$8 sm:$0xf0]   ;;  %610 = vst.msk [vmem:[%s1463_s1 + $0x30] sm:$0xff] %vm6_vm1, %v58_v32  }
  0x3a   :  { %359 = vrot.lane.b32.xlu0 %v358_v20, %s761_s18  ;;  %v22_v37 = vsel %vm4_vm0, %v597_v35, %v596_v33  ;;  %v611_v38 = vld [vmem:[%s1462_s0 + $0x1c0] ss:$8 sm:$0xf]  }
  0x3b   :  { %v612_v39 = vld [vmem:[%s1462_s0 + $0x1c0] ss:$8 sm:$0xf0]   ;;  %598 = vst.msk [vmem:[%s1463_s1 + $0x10] sm:$0xff] %vm6_vm1, %v22_v37  }
  0x3c   :  { %v67_v42 = vsel %vm4_vm0, %v612_v39, %v611_v38  ;;  %v599_v43 = vld [vmem:[%s1462_s0 + $0xc0] ss:$8 sm:$0xf]   ;;  %392 = vrot.lane.b32.xlu1 %v391_v36, %s761_s18 }
  0x3d   :  { %v600_v45 = vld [vmem:[%s1462_s0 + $0xc0] ss:$8 sm:$0xf0]   ;;  %613 = vst.msk [vmem:[%s1463_s1 + $0x38] sm:$0xff] %vm6_vm1, %v67_v42  }
  0x3e   :  { %v31_v49 = vsel %vm4_vm0, %v600_v45, %v599_v43  ;;  %381 = vrot.lane.b32.xlu0 %v380_v41, %s761_s18 }
  0x3f   :  { %601 = vst.msk [vmem:[%s1463_s1 + $0x18] sm:$0xff] %vm6_vm1, %v31_v49  }
  0x40   :  { %414 = vrot.lane.b32.xlu1 %v413_v50, %s761_s18 }
  0x42   :  { %403 = vrot.lane.b32.xlu0 %v402_v51, %s761_s18  ;;  %s762_s18 = smov 14  }
  0x44   :  { %435 = vrot.lane.b32.xlu1 %v934_v62, %s762_s18 }
  0x46   :  { %425 = vrot.lane.b32.xlu0 %v951_v4, %s762_s18 }
  0x48   :  { %457 = vrot.lane.b32.xlu1 %v961_v8, %s762_s18 }
  0x4a   :  { %446 = vrot.lane.b32.xlu0 %v970_v11, %s762_s18 }
  0x4c   :  { %479 = vrot.lane.b32.xlu1 %v986_v16, %s762_s18 }
  0x4e   :  { %468 = vrot.lane.b32.xlu0 %v1003_v22, %s762_s18 }
  0x50   :  { %501 = vrot.lane.b32.xlu1 %v1013_v26, %s762_s18 }
  0x52   :  { %490 = vrot.lane.b32.xlu0 %v1022_v29, %s762_s18 }
  0x54   :  { %522 = vrot.lane.b32.xlu1 %v1038_v34, %s763_s21 }
  0x56   :  { %512 = vrot.lane.b32.xlu0 %v1055_v40, %s763_s21 }
  0x58   :  { %544 = vrot.lane.b32.xlu1 %v1065_v44, %s763_s21 }
  0x5a   :  { %533 = vrot.lane.b32.xlu0 %v1074_v47, %s763_s21 }
  0x5c   :  { %566 = vrot.lane.b32.xlu1 %v1090_v52, %s763_s21 }
  0x5e   :  { %555 = vrot.lane.b32.xlu0 %v1107_v58, %s763_s21 }
  0x60   :  { %588 = vrot.lane.b32.xlu1 %v1117_v63, %s763_s21 }
  0x62   :  { %577 = vrot.lane.b32.xlu0 %v1126_v2, %s763_s21 }
  0x76   :  { %v99_v62 = vpop.permute.xlu1 %98  }
  0x77   :  { %621 = vst.msk [vmem:[%s1463_s1 + $0x8] sm:$0xff] %vm79_vm2, %v99_v62  }
  0x78   :  { %v78_v4 = vpop.permute.xlu0 %77  }
  0x79   :  { %80 = vst.msk [vmem:[%s1463_s1] sm:$0xff] %vm79_vm2, %v78_v4  }
  0x7a   :  { %v110_v8 = vpop.permute.xlu1 %109  }
  0x7b   :  { %624 = vst.msk [vmem:[%s1463_s1 + $0x28] sm:$0xff] %vm79_vm2, %v110_v8  }
  0x7c   :  { %v88_v11 = vpop.permute.xlu0 %87  }
  0x7d   :  { %618 = vst.msk [vmem:[%s1463_s1 + $0x20] sm:$0xff] %vm79_vm2, %v88_v11  }
  0x7e   :  { %v132_v16 = vpop.permute.xlu1 %131  }
  0x7f   :  { %630 = vst.msk [vmem:[%s1463_s1 + $0x30] sm:$0xff] %vm79_vm2, %v132_v16  }
  0x80   :  { %v121_v22 = vpop.permute.xlu0 %120  }
  0x81   :  { %627 = vst.msk [vmem:[%s1463_s1 + $0x10] sm:$0xff] %vm79_vm2, %v121_v22  }
  0x82   :  { %v154_v26 = vpop.permute.xlu1 %153  }
  0x83   :  { %636 = vst.msk [vmem:[%s1463_s1 + $0x38] sm:$0xff] %vm79_vm2, %v154_v26  }
  0x84   :  { %v143_v29 = vpop.permute.xlu0 %142  }
  0x85   :  { %633 = vst.msk [vmem:[%s1463_s1 + $0x18] sm:$0xff] %vm79_vm2, %v143_v29  }
  0x86   :  { %v175_v34 = vpop.permute.xlu1 %174  }
  0x87   :  { %641 = vst.msk [vmem:[%s1463_s1 + $0x20] sm:$0xff] %vm166_vm3, %v175_v34  }
  0x88   :  { %v165_v40 = vpop.permute.xlu0 %164  }
  0x89   :  { %167 = vst.msk [vmem:[%s1463_s1] sm:$0xff] %vm166_vm3, %v165_v40  }
  0x8a   :  { %v197_v44 = vpop.permute.xlu1 %196  }
  0x8b   :  { %647 = vst.msk [vmem:[%s1463_s1 + $0x28] sm:$0xff] %vm166_vm3, %v197_v44  }
  0x8c   :  { %v186_v47 = vpop.permute.xlu0 %185  }
  0x8d   :  { %644 = vst.msk [vmem:[%s1463_s1 + $0x8] sm:$0xff] %vm166_vm3, %v186_v47  }
  0x8e   :  { %v219_v52 = vpop.permute.xlu1 %218  }
  0x8f   :  { %653 = vst.msk [vmem:[%s1463_s1 + $0x30] sm:$0xff] %vm166_vm3, %v219_v52  }
  0x90   :  { %v208_v53 = vpop.permute.xlu0 %207  }
  0x91   :  { %650 = vst.msk [vmem:[%s1463_s1 + $0x10] sm:$0xff] %vm166_vm3, %v208_v53  }
  0x92   :  { %v241_v54 = vpop.permute.xlu1 %240  }
  0x93   :  { %659 = vst.msk [vmem:[%s1463_s1 + $0x38] sm:$0xff] %vm166_vm3, %v241_v54  }
  0x94   :  { %v230_v55 = vpop.permute.xlu0 %229  }
  0x95   :  { %656 = vst.msk [vmem:[%s1463_s1 + $0x18] sm:$0xff] %vm166_vm3, %v230_v55  }
  0x96   :  { %v262_v56 = vpop.permute.xlu1 %261  }
  0x97   :  { %664 = vst.msk [vmem:[%s1463_s1 + $0x20] sm:$0xff] %vm253_vm4, %v262_v56  }
  0x98   :  { %v252_v57 = vpop.permute.xlu0 %251  }
  0x99   :  { %254 = vst.msk [vmem:[%s1463_s1] sm:$0xff] %vm253_vm4, %v252_v57  }
  0x9a   :  { %v284_v58 = vpop.permute.xlu1 %283  }
  0x9b   :  { %670 = vst.msk [vmem:[%s1463_s1 + $0x28] sm:$0xff] %vm253_vm4, %v284_v58  }
  0x9c   :  { %v273_v59 = vpop.permute.xlu0 %272  }
  0x9d   :  { %667 = vst.msk [vmem:[%s1463_s1 + $0x8] sm:$0xff] %vm253_vm4, %v273_v59  }
  0x9e   :  { %v306_v60 = vpop.permute.xlu1 %305  }
  0x9f   :  { %676 = vst.msk [vmem:[%s1463_s1 + $0x30] sm:$0xff] %vm253_vm4, %v306_v60  }
  0xa0   :  { %v295_v61 = vpop.permute.xlu0 %294  }
  0xa1   :  { %673 = vst.msk [vmem:[%s1463_s1 + $0x10] sm:$0xff] %vm253_vm4, %v295_v61  }
  0xa2   :  { %v328_v63 = vpop.permute.xlu1 %327  }
  0xa3   :  { %682 = vst.msk [vmem:[%s1463_s1 + $0x38] sm:$0xff] %vm253_vm4, %v328_v63  }
  0xa4   :  { %v317_v0 = vpop.permute.xlu0 %316  }
  0xa5   :  { %679 = vst.msk [vmem:[%s1463_s1 + $0x18] sm:$0xff] %vm253_vm4, %v317_v0  }
  0xa6   :  { %v349_v1 = vpop.permute.xlu1 %348  }
  0xa7   :  { %687 = vst.msk [vmem:[%s1463_s1 + $0x20] sm:$0xff] %vm340_vm5, %v349_v1  }
  0xa8   :  { %v339_v2 = vpop.permute.xlu0 %338  }
  0xa9   :  { %341 = vst.msk [vmem:[%s1463_s1] sm:$0xff] %vm340_vm5, %v339_v2  }
  0xaa   :  { %v371_v3 = vpop.permute.xlu1 %370  }
  0xab   :  { %693 = vst.msk [vmem:[%s1463_s1 + $0x28] sm:$0xff] %vm340_vm5, %v371_v3  }
  0xac   :  { %v360_v5 = vpop.permute.xlu0 %359  }
  0xad   :  { %690 = vst.msk [vmem:[%s1463_s1 + $0x8] sm:$0xff] %vm340_vm5, %v360_v5  }
  0xae   :  { %v393_v6 = vpop.permute.xlu1 %392  }
  0xaf   :  { %699 = vst.msk [vmem:[%s1463_s1 + $0x30] sm:$0xff] %vm340_vm5, %v393_v6  }
  0xb0   :  { %v382_v7 = vpop.permute.xlu0 %381  }
  0xb1   :  { %696 = vst.msk [vmem:[%s1463_s1 + $0x10] sm:$0xff] %vm340_vm5, %v382_v7  }
  0xb2   :  { %v415_v9 = vpop.permute.xlu1 %414  }
  0xb3   :  { %705 = vst.msk [vmem:[%s1463_s1 + $0x38] sm:$0xff] %vm340_vm5, %v415_v9  }
  0xb4   :  { %v404_v10 = vpop.permute.xlu0 %403  }
  0xb5   :  { %702 = vst.msk [vmem:[%s1463_s1 + $0x18] sm:$0xff] %vm340_vm5, %v404_v10  }
  0xb6   :  { %v436_v12 = vpop.permute.xlu1 %435  }
  0xb7   :  { %710 = vst.msk [vmem:[%s1463_s1 + $0x20] sm:$0xff] %vm427_vm6, %v436_v12  }
  0xb8   :  { %v426_v13 = vpop.permute.xlu0 %425  }
  0xb9   :  { %428 = vst.msk [vmem:[%s1463_s1] sm:$0xff] %vm427_vm6, %v426_v13  }
  0xba   :  { %v458_v14 = vpop.permute.xlu1 %457  }
  0xbb   :  { %716 = vst.msk [vmem:[%s1463_s1 + $0x28] sm:$0xff] %vm427_vm6, %v458_v14  }
  0xbc   :  { %v447_v15 = vpop.permute.xlu0 %446  }
  0xbd   :  { %713 = vst.msk [vmem:[%s1463_s1 + $0x8] sm:$0xff] %vm427_vm6, %v447_v15  }
  0xbe   :  { %v480_v17 = vpop.permute.xlu1 %479  }
  0xbf   :  { %722 = vst.msk [vmem:[%s1463_s1 + $0x30] sm:$0xff] %vm427_vm6, %v480_v17  }
  0xc0   :  { %v469_v18 = vpop.permute.xlu0 %468  }
  0xc1   :  { %719 = vst.msk [vmem:[%s1463_s1 + $0x10] sm:$0xff] %vm427_vm6, %v469_v18  }
  0xc2   :  { %v502_v19 = vpop.permute.xlu1 %501  }
  0xc3   :  { %728 = vst.msk [vmem:[%s1463_s1 + $0x38] sm:$0xff] %vm427_vm6, %v502_v19  }
  0xc4   :  { %v491_v20 = vpop.permute.xlu0 %490  }
  0xc5   :  { %725 = vst.msk [vmem:[%s1463_s1 + $0x18] sm:$0xff] %vm427_vm6, %v491_v20  }
  0xc6   :  { %v523_v21 = vpop.permute.xlu1 %522  }
  0xc7   :  { %733 = vst.msk [vmem:[%s1463_s1 + $0x20] sm:$0xff] %vm514_vm7, %v523_v21  }
  0xc8   :  { %v513_v23 = vpop.permute.xlu0 %512  }
  0xc9   :  { %515 = vst.msk [vmem:[%s1463_s1] sm:$0xff] %vm514_vm7, %v513_v23  }
  0xca   :  { %v545_v24 = vpop.permute.xlu1 %544  }
  0xcb   :  { %739 = vst.msk [vmem:[%s1463_s1 + $0x28] sm:$0xff] %vm514_vm7, %v545_v24  }
  0xcc   :  { %v534_v25 = vpop.permute.xlu0 %533  }
  0xcd   :  { %736 = vst.msk [vmem:[%s1463_s1 + $0x8] sm:$0xff] %vm514_vm7, %v534_v25  }
  0xce   :  { %v567_v27 = vpop.permute.xlu1 %566  }
  0xcf   :  { %745 = vst.msk [vmem:[%s1463_s1 + $0x30] sm:$0xff] %vm514_vm7, %v567_v27  }
  0xd0   :  { %v556_v28 = vpop.permute.xlu0 %555  }
  0xd1   :  { %742 = vst.msk [vmem:[%s1463_s1 + $0x10] sm:$0xff] %vm514_vm7, %v556_v28  }
  0xd2   :  { %v589_v30 = vpop.permute.xlu1 %588  }
  0xd3   :  { %751 = vst.msk [vmem:[%s1463_s1 + $0x38] sm:$0xff] %vm514_vm7, %v589_v30  }
  0xd4   :  { %v578_v31 = vpop.permute.xlu0 %577  }
  0xd5   :  { %748 = vst.msk [vmem:[%s1463_s1 + $0x18] sm:$0xff] %vm514_vm7, %v578_v31  }

// kernel: tile.23
= control target key start
LH: loop header
LB: loop body
LE: loop exit
PB: predicated region body
PF: predicated region fallthrough
CT: control target
= control target key end

     0   :  { %s28_s0 = inlined_call_operand.vmem [shape: f32[8], index: 0, kind: input, shape index: {}]   ;;  %s29_s1 = inlined_call_operand.vmem [shape: f32[16,8], index: 1, kind: output, shape index: {}]  }
   0x1   :  { %v4_v0 = vld [vmem:[%s28_s0] ss:$0 sm:$0xff] }
   0x2   :  { %5 = vst [vmem:[%s29_s1] sm:$0xff] %v4_v0  ;;  %8 = vst [vmem:[%s29_s1 + $0x8] sm:$0xff] %v4_v0 }

// kernel: tile.24
= control target key start
LH: loop header
LB: loop body
LE: loop exit
PB: predicated region body
PF: predicated region fallthrough
CT: control target
= control target key end

     0   :  { %s133_s10 = smov 120   ;;  %s134_s11 = smov 104   ;;  %vm3_vm0 = vcmask 64512   ;;  %vm9_vm1 = vcmask 1048512   ;;  %vm15_vm2 = vcmask 982912   ;;  %vm21_vm3 = vcmask 917312   ;;  %s209_s0 = inlined_call_operand.vmem [shape: f32[16,8], index: 0, kind: input, shape index: {}]   ;;  %s210_s1 = inlined_call_operand.vmem [shape: f32[1,128], index: 1, kind: output, shape index: {}]  }
   0x1   :  { %v103_v0 = vld [vmem:[%s209_s0 + $0xf] sm:$0x1]   ;;  %v105_v1 = vld [vmem:[%s209_s0 + $0xd] sm:$0x1]   ;;  %v104_v2 = vld [vmem:[%s209_s0 + $0xe] sm:$0x1]  }
   0x2   :  { %7 = vrot.lane.b32.xlu0 %v103_v0, %s133_s10  ;;  %19 = vrot.lane.b32.xlu1 %v105_v1, %s134_s11  ;;  %v106_v3 = vld [vmem:[%s209_s0 + $0xc] sm:$0x1]   ;;  %s135_s16 = smov 112   ;;  %s136_s17 = smov 96   ;;  %v107_v4 = vld [vmem:[%s209_s0 + $0xb] sm:$0x1]  }
   0x3   :  { %v108_v5 = vld [vmem:[%s209_s0 + $0xa] sm:$0x1]   ;;  %v2_v6 = vld [vmem:[%s209_s0] sm:$0x1]   ;;  %s137_s24 = smov 88   ;;  %s138_s25 = smov 80  }
   0x4   :  { %4 = vst.msk [vmem:[#allocation0] sm:$0x1] %vm3_vm0, %v2_v6   ;;  %v109_v7 = vld [vmem:[%s209_s0 + $0x9] sm:$0x1]   ;;  %v110_v8 = vld [vmem:[%s209_s0 + $0x8] sm:$0x1]  }
   0x5   :  { %s139_s30 = smov 72   ;;  %s140_s2 = smov 64   ;;  %v111_v9 = vld [vmem:[%s209_s0 + $0x7] sm:$0x1]   ;;  %v112_v10 = vld [vmem:[%s209_s0 + $0x6] sm:$0x1]  }
   0x6   :  { %13 = vrot.lane.b32.xlu0 %v104_v2, %s135_s16  ;;  %25 = vrot.lane.b32.xlu1 %v106_v3, %s136_s17  ;;  %s141_s7 = smov 56   ;;  %s142_s8 = smov 48   ;;  %v113_v11 = vld [vmem:[%s209_s0 + $0x5] sm:$0x1]   ;;  %v114_v12 = vld [vmem:[%s209_s0 + $0x4] sm:$0x1]  }
   0x7   :  { %s143_s13 = smov 40   ;;  %s144_s14 = smov 32   ;;  %v115_v13 = vld [vmem:[%s209_s0 + $0x3] sm:$0x1]   ;;  %v116_v14 = vld [vmem:[%s209_s0 + $0x2] sm:$0x1]  }
   0x8   :  { %s145_s19 = smov 24   ;;  %s146_s20 = smov 16   ;;  %v117_v15 = vld [vmem:[%s209_s0 + $0x1] sm:$0x1]   ;;  %vm27_vm4 = vcmask 851712   ;;  %vm33_vm5 = vcmask 786112  }
   0x9   :  { %s147_s0 = smov 8   ;;  %vm39_vm6 = vcmask 720512   ;;  %vm45_vm7 = vcmask 654912   ;;  %vm51_vm8 = vcmask 589312   ;;  %vm57_vm9 = vcmask 523712  }
   0xa   :  { %31 = vrot.lane.b32.xlu0 %v107_v4, %s137_s24  ;;  %37 = vrot.lane.b32.xlu1 %v108_v5, %s138_s25  ;;  %vm63_vm10 = vcmask 458112   ;;  %vm69_vm11 = vcmask 392512   ;;  %vm75_vm12 = vcmask 326912   ;;  %vm81_vm13 = vcmask 261312  }
   0xb   :  { %vm87_vm14 = vcmask 195712   ;;  %vm93_vm15 = vcmask 130112  }
   0xe   :  { %43 = vrot.lane.b32.xlu0 %v109_v7, %s139_s30  ;;  %49 = vrot.lane.b32.xlu1 %v110_v8, %s140_s2 }
  0x12   :  { %55 = vrot.lane.b32.xlu0 %v111_v9, %s141_s7  ;;  %61 = vrot.lane.b32.xlu1 %v112_v10, %s142_s8 }
  0x16   :  { %67 = vrot.lane.b32.xlu0 %v113_v11, %s143_s13  ;;  %73 = vrot.lane.b32.xlu1 %v114_v12, %s144_s14 }
  0x1a   :  { %79 = vrot.lane.b32.xlu0 %v115_v13, %s145_s19  ;;  %85 = vrot.lane.b32.xlu1 %v116_v14, %s146_s20 }
  0x1e   :  { %91 = vrot.lane.b32.xlu0 %v117_v15, %s147_s0 }
  0x74   :  { %v8_v16 = vpop.permute.xlu0 %7   ;;  %v20_v17 = vpop.permute.xlu1 %19  }
  0x75   :  { %10 = vst.msk [vmem:[#allocation0] sm:$0x1] %vm9_vm1, %v8_v16  }
  0x78   :  { %v14_v18 = vpop.permute.xlu0 %13   ;;  %v26_v19 = vpop.permute.xlu1 %25  }
  0x79   :  { %16 = vst.msk [vmem:[#allocation0] sm:$0x1] %vm15_vm2, %v14_v18  }
  0x7a   :  { %22 = vst.msk [vmem:[#allocation0] sm:$0x1] %vm21_vm3, %v20_v17  }
  0x7b   :  { %28 = vst.msk [vmem:[#allocation0] sm:$0x1] %vm27_vm4, %v26_v19  }
  0x7c   :  { %v32_v20 = vpop.permute.xlu0 %31   ;;  %v38_v21 = vpop.permute.xlu1 %37  }
  0x7d   :  { %34 = vst.msk [vmem:[#allocation0] sm:$0x1] %vm33_vm5, %v32_v20  }
  0x7e   :  { %40 = vst.msk [vmem:[#allocation0] sm:$0x1] %vm39_vm6, %v38_v21  }
  0x80   :  { %v44_v22 = vpop.permute.xlu0 %43   ;;  %v50_v23 = vpop.permute.xlu1 %49  }
  0x81   :  { %46 = vst.msk [vmem:[#allocation0] sm:$0x1] %vm45_vm7, %v44_v22  }
  0x82   :  { %52 = vst.msk [vmem:[#allocation0] sm:$0x1] %vm51_vm8, %v50_v23  }
  0x84   :  { %v56_v24 = vpop.permute.xlu0 %55   ;;  %v62_v25 = vpop.permute.xlu1 %61  }
  0x85   :  { %58 = vst.msk [vmem:[#allocation0] sm:$0x1] %vm57_vm9, %v56_v24  }
  0x86   :  { %64 = vst.msk [vmem:[#allocation0] sm:$0x1] %vm63_vm10, %v62_v25  }
  0x88   :  { %v68_v26 = vpop.permute.xlu0 %67   ;;  %v74_v27 = vpop.permute.xlu1 %73  }
  0x89   :  { %70 = vst.msk [vmem:[#allocation0] sm:$0x1] %vm69_vm11, %v68_v26  }
  0x8a   :  { %76 = vst.msk [vmem:[#allocation0] sm:$0x1] %vm75_vm12, %v74_v27  }
  0x8c   :  { %v80_v28 = vpop.permute.xlu0 %79   ;;  %v86_v29 = vpop.permute.xlu1 %85  }
  0x8d   :  { %82 = vst.msk [vmem:[#allocation0] sm:$0x1] %vm81_vm13, %v80_v28  }
  0x8e   :  { %88 = vst.msk [vmem:[#allocation0] sm:$0x1] %vm87_vm14, %v86_v29  }
  0x90   :  { %v92_v30 = vpop.permute.xlu0 %91  }
  0x91   :  { %94 = vst.msk [vmem:[#allocation0] sm:$0x1] %vm93_vm15, %v92_v30  }
  0x98   :  { %v99_v31 = vld [vmem:[#allocation0] sm:$0x1] }
  0x99   :  { %102 = vst [vmem:[%s210_s1] sm:$0x1] %v99_v31 }

// kernel: sepconv7x7.3
= control target key start
LH: loop header
LB: loop body
LE: loop exit
PB: predicated region body
PF: predicated region fallthrough
CT: control target
= control target key end

     0   :  { %s144_s0 = inlined_call_operand.vmem [shape: f32[32,128], index: 0, kind: input, shape index: {}]   ;;  %s145_s1 = inlined_call_operand.vmem [shape: f32[1,128], index: 1, kind: input, shape index: {}]   ;;  %s146_s2 = inlined_call_operand.vmem [shape: f32[1,128], index: 2, kind: input, shape index: {}]   ;;  %s147_s3 = inlined_call_operand.vmem [shape: f32[32,128], index: 3, kind: output, shape index: {}]  }
   0x1   :  { %v14_v0 = vld [vmem:[%s144_s0] sm:$0xff]  ;;  %v15_v4 = vld [vmem:[%s144_s0 + $0x8] sm:$0xff]  ;;  %v16_v5 = vld [vmem:[%s144_s0 + $0x10] sm:$0xff] }
   0x2   :  { %v76_v1 = vld [vmem:[%s145_s1] ss:$0 sm:$0xff]  ;;  %v17_v6 = vld [vmem:[%s144_s0 + $0x18] sm:$0xff] }
   0x3   :  { %v77_v2 = vld [vmem:[%s146_s2] ss:$0 sm:$0xff]  ;;  %v25_v3 = vmul.f32 %v76_v1, %v14_v0  ;;  %v26_v7 = vmul.f32 %v76_v1, %v15_v4  ;;  %v27_v8 = vmul.f32 %v76_v1, %v16_v5  ;;  %v28_v9 = vmul.f32 %v76_v1, %v17_v6 }
   0x5   :  { %v36_v10 = vadd.f32 %v77_v2, %v25_v3  ;;  %v37_v11 = vadd.f32 %v77_v2, %v26_v7  ;;  %v38_v12 = vadd.f32 %v77_v2, %v27_v8  ;;  %v39_v13 = vadd.f32 %v77_v2, %v28_v9 }
   0x7   :  { %v40_v14 = vsub.f32 0.0, %v36_v10  ;;  %v41_v15 = vsub.f32 0.0, %v37_v11  ;;  %v42_v16 = vsub.f32 0.0, %v38_v12  ;;  %v43_v17 = vsub.f32 0.0, %v39_v13 }
   0x9   :  { %v44_v18 = vmul.f32 1.442695, %v40_v14  ;;  %v46_v19 = vmul.f32 1.442695, %v41_v15  ;;  %v48_v20 = vmul.f32 1.442695, %v42_v16 }
   0xa   :  { %v50_v21 = vmul.f32 1.442695, %v43_v17 }
   0xb   :  { %78 = vpow2.f32 %v44_v18 }
   0xc   :  { %80 = vpow2.f32 %v46_v19 }
   0xd   :  { %82 = vpow2.f32 %v48_v20 }
   0xe   :  { %84 = vpow2.f32 %v50_v21 }
  0x18   :  { %v79_v22 = vpop.eup %78 }
  0x19   :  { %v81_v23 = vpop.eup %80  ;;  %v52_v24 = vadd.f32 1.0, %v79_v22 }
  0x1a   :  { %v83_v25 = vpop.eup %82  ;;  %v53_v26 = vadd.f32 1.0, %v81_v23 }
  0x1b   :  { %v85_v27 = vpop.eup %84  ;;  %86 = vrcp.f32 %v52_v24  ;;  %v54_v28 = vadd.f32 1.0, %v83_v25 }
  0x1c   :  { %88 = vrcp.f32 %v53_v26  ;;  %v55_v29 = vadd.f32 1.0, %v85_v27 }
  0x1d   :  { %90 = vrcp.f32 %v54_v28 }
  0x1e   :  { %92 = vrcp.f32 %v55_v29 }
  0x28   :  { %v87_v30 = vpop.eup %86 }
  0x29   :  { %v89_v31 = vpop.eup %88  ;;  %v64_v32 = vmul.f32 %v87_v30, %v36_v10 }
  0x2a   :  { %v91_v33 = vpop.eup %90  ;;  %v65_v34 = vmul.f32 %v89_v31, %v37_v11 }
  0x2b   :  { %v93_v35 = vpop.eup %92  ;;  %68 = vst [vmem:[%s147_s3] sm:$0xff] %v64_v32  ;;  %v66_v36 = vmul.f32 %v91_v33, %v38_v12 }
  0x2c   :  { %69 = vst [vmem:[%s147_s3 + $0x8] sm:$0xff] %v65_v34  ;;  %v67_v37 = vmul.f32 %v93_v35, %v39_v13 }
  0x2d   :  { %70 = vst [vmem:[%s147_s3 + $0x10] sm:$0xff] %v66_v36 }
  0x2e   :  { %71 = vst [vmem:[%s147_s3 + $0x18] sm:$0xff] %v67_v37 }

// kernel: sepconv7x7.2
= control target key start
LH: loop header
LB: loop body
LE: loop exit
PB: predicated region body
PF: predicated region fallthrough
CT: control target
= control target key end

     0   :  { %s1838_s15 = smov 0   ;;  %s2544_s0 = inlined_call_operand.vmem [shape: f32[2,22,128], index: 0, kind: input, shape index: {}]   ;;  %s2545_s1 = inlined_call_operand.vmem [shape: f32[49,64], index: 1, kind: input, shape index: {}]   ;;  %s2546_s2 = inlined_call_operand.vmem [shape: f32[64,128], index: 2, kind: input, shape index: {}]   ;;  %s2547_s3 = inlined_call_operand.vmem [shape: f32[2,16,128], index: 3, kind: output, shape index: {0}]   ;;  %s2548_s4 = inlined_call_operand.vmem [shape: f32[2,2,128], index: 4, kind: output, shape index: {1}]  }
   0x1 LB: > { %s1677_s16 = sadd.s32 4294967295, %s1799_s15   ;;  %p1681_p0 = scmp.ge.s32.totalorder %s1799_s15, 1  ;;  %s1799_s15 = sphi %s1838_s15, %s15_s15  }
   0x2   : > { %p165_p1 = scmp.lt.s32.totalorder %s1799_s15, 3 }
   0x4   : > { %p166_p2 = pnand %p1681_p0, %p165_p1 }
   0x5   : > { %s1801_s19 = smov (!%p166_p2), 4   ;;  %s1802_s10 = smov (!%p166_p2), 8  }
   0x6   : > { %169 = sbr.rel (%p166_p2) target bundleno = 639 (0x27f), region = 32  ;;  %s1803_s27 = smov (!%p166_p2), 12  }
   0x7   : > { %s1804_s18 = smov (!%p166_p2), 16   ;;  %s1805_s7 = smov (!%p166_p2), 20  }
   0x8   : > { %s1806_s24 = smov (!%p166_p2), 24   ;;  %p195_p3 = scmp.lt.s32.totalorder (!%p166_p2), %s1677_s16, 1 }
   0x9   : > { %s1807_s13 = smov (!%p166_p2), 124   ;;  %s1808_s14 = smov (!%p166_p2), 120  }
   0xa   : > { %s1809_s17 = smov (!%p166_p2), 116   ;;  %s1810_s20 = smov (!%p166_p2), 112  }
   0xb   : > { %v1694_v0 = vld [vmem:[%s2545_s1 + $0x8] ss:$0 sm:$0xff]  ;;  %v1693_v1 = vld [vmem:[%s2545_s1 + $0x1] ss:$0 sm:$0xff]  ;;  %v1695_v2 = vld [vmem:[%s2545_s1 + $0xf] ss:$0 sm:$0xff] }
   0xc   : > { %374 = vrot.lane.b32.xlu0 %v1694_v0, %s1801_s19  ;;  %402 = vrot.lane.b32.xlu1 %v1695_v2, %s1801_s19  ;;  %v1696_v3 = vld [vmem:[%s2545_s1 + $0x16] ss:$0 sm:$0xff]  ;;  %v1697_v4 = vld [vmem:[%s2545_s1 + $0x1d] ss:$0 sm:$0xff]  ;;  %s2550_s16 = smov (!%p195_p3, %s1677_s16), 1  ;;  %vm232_vm0 = vcmask 1046528  }
   0xd   : > { %v1698_v5 = vld [vmem:[%s2545_s1 + $0x24] ss:$0 sm:$0xff]  ;;  %v1699_v6 = vld [vmem:[%s2545_s1 + $0x2b] ss:$0 sm:$0xff]  ;;  %v1701_v7 = vld [vmem:[%s2545_s1 + $0x9] ss:$0 sm:$0xff] }
   0xe   : > { %v1700_v8 = vld [vmem:[%s2545_s1 + $0x2] ss:$0 sm:$0xff]  ;;  %v1702_v9 = vld [vmem:[%s2545_s1 + $0x10] ss:$0 sm:$0xff]  ;;  %v1703_v10 = vld [vmem:[%s2545_s1 + $0x17] ss:$0 sm:$0xff] }
   0xf   : > { %v1704_v11 = vld [vmem:[%s2545_s1 + $0x1e] ss:$0 sm:$0xff]  ;;  %v1705_v12 = vld [vmem:[%s2545_s1 + $0x25] ss:$0 sm:$0xff]  ;;  %v1706_v13 = vld [vmem:[%s2545_s1 + $0x2c] ss:$0 sm:$0xff] }
  0x10   : > { %353 = vrot.lane.b32.xlu0 %v1693_v1, %s1801_s19  ;;  %430 = vrot.lane.b32.xlu1 %v1696_v3, %s1801_s19  ;;  %v1708_v14 = vld [vmem:[%s2545_s1 + $0xa] ss:$0 sm:$0xff]  ;;  %v1707_v15 = vld [vmem:[%s2545_s1 + $0x3] ss:$0 sm:$0xff]  ;;  %s1769_s9 = smul.u32 24, %s2550_s16  ;;  %vm253_vm1 = vcmask 1045504  }
  0x11   : > { %v1709_v16 = vld [vmem:[%s2545_s1 + $0x11] ss:$0 sm:$0xff]  ;;  %v1710_v17 = vld [vmem:[%s2545_s1 + $0x18] ss:$0 sm:$0xff]  ;;  %v1711_v18 = vld [vmem:[%s2545_s1 + $0x1f] ss:$0 sm:$0xff] }
  0x12   : > { %v1712_v19 = vld [vmem:[%s2545_s1 + $0x26] ss:$0 sm:$0xff]  ;;  %v1713_v20 = vld [vmem:[%s2545_s1 + $0x2d] ss:$0 sm:$0xff]  ;;  %v1715_v21 = vld [vmem:[%s2545_s1 + $0xb] ss:$0 sm:$0xff]  ;;  %s1982_s12 = scalar_lea.vmem %s2544_s0, %s1769_s9 }
  0x13   : > { %v1714_v22 = vld [vmem:[%s2545_s1 + $0x4] ss:$0 sm:$0xff]  ;;  %v1716_v23 = vld [vmem:[%s2545_s1 + $0x12] ss:$0 sm:$0xff]  ;;  %v1717_v24 = vld [vmem:[%s2545_s1 + $0x19] ss:$0 sm:$0xff] }
  0x14   : > { %458 = vrot.lane.b32.xlu0 %v1697_v4, %s1801_s19  ;;  %486 = vrot.lane.b32.xlu1 %v1698_v5, %s1801_s19  ;;  %v1718_v25 = vld [vmem:[%s2545_s1 + $0x20] ss:$0 sm:$0xff]  ;;  %v1719_v26 = vld [vmem:[%s2545_s1 + $0x27] ss:$0 sm:$0xff]  ;;  %vm274_vm2 = vcmask 1044480   ;;  %vm295_vm3 = vcmask 1043456  }
  0x15   : > { %v1720_v27 = vld [vmem:[%s2545_s1 + $0x2e] ss:$0 sm:$0xff]  ;;  %v1722_v28 = vld [vmem:[%s2545_s1 + $0xc] ss:$0 sm:$0xff]  ;;  %v1721_v29 = vld [vmem:[%s2545_s1 + $0x5] ss:$0 sm:$0xff] }
  0x16   : > { %v1723_v30 = vld [vmem:[%s2545_s1 + $0x13] ss:$0 sm:$0xff]  ;;  %v1724_v31 = vld [vmem:[%s2545_s1 + $0x1a] ss:$0 sm:$0xff]  ;;  %v1725_v32 = vld [vmem:[%s2545_s1 + $0x21] ss:$0 sm:$0xff] }
  0x17   : > { %v1726_v33 = vld [vmem:[%s2545_s1 + $0x28] ss:$0 sm:$0xff]  ;;  %v1727_v34 = vld [vmem:[%s2545_s1 + $0x2f] ss:$0 sm:$0xff]  ;;  %v1729_v35 = vld [vmem:[%s2545_s1 + $0xd] ss:$0 sm:$0xff] }
  0x18   : > { %514 = vrot.lane.b32.xlu0 %v1699_v6, %s1801_s19  ;;  %563 = vrot.lane.b32.xlu1 %v1701_v7, %s1802_s10  ;;  %v1731_v36 = vld [vmem:[%s2545_s1 + $0x1b] ss:$0 sm:$0xff]  ;;  %v1728_v37 = vld [vmem:[%s2545_s1 + $0x6] ss:$0 sm:$0xff]  ;;  %vm316_vm4 = vcmask 1042432   ;;  %vm337_vm5 = vcmask 1041408  }
  0x19   : > { %v1733_v38 = vld [vmem:[%s2545_s1 + $0x29] ss:$0 sm:$0xff]  ;;  %v1730_v39 = vld [vmem:[%s2545_s1 + $0x14] ss:$0 sm:$0xff]  ;;  %v1732_v40 = vld [vmem:[%s2545_s1 + $0x22] ss:$0 sm:$0xff] }
  0x1a   : > { %v1734_v41 = vld [vmem:[%s2545_s1 + $0x30] ss:$0 sm:$0xff]  ;;  %v1985_v44 = vld [vmem:[%s1982_s12] sm:$0xff]  ;;  %v1988_v45 = vld [vmem:[%s1982_s12 + $0x8] sm:$0xff]  ;;  %s1812_s8 = smov 104   ;;  %vm1489_vm6 = vcmask 523264  }
  0x1b   : > { %v1995_v51 = vld [vmem:[%s1982_s12 + $0x10] sm:$0x3f]  ;;  %s1685_s5 = sshll.u32 %s2550_s16, 1 }
  0x1c   : > { %542 = vrot.lane.b32.xlu0 %v1700_v8, %s1802_s10  ;;  %591 = vrot.lane.b32.xlu1 %v1702_v9, %s1802_s10 }
  0x20   : > { %619 = vrot.lane.b32.xlu0 %v1703_v10, %s1802_s10  ;;  %647 = vrot.lane.b32.xlu1 %v1704_v11, %s1802_s10 }
  0x24   : > { %675 = vrot.lane.b32.xlu0 %v1705_v12, %s1802_s10  ;;  %703 = vrot.lane.b32.xlu1 %v1706_v13, %s1802_s10 }
  0x28   : > { %752 = vrot.lane.b32.xlu0 %v1708_v14, %s1803_s27  ;;  %731 = vrot.lane.b32.xlu1 %v1707_v15, %s1803_s27 }
  0x2c   : > { %780 = vrot.lane.b32.xlu0 %v1709_v16, %s1803_s27  ;;  %808 = vrot.lane.b32.xlu1 %v1710_v17, %s1803_s27 }
  0x30   : > { %836 = vrot.lane.b32.xlu0 %v1711_v18, %s1803_s27  ;;  %864 = vrot.lane.b32.xlu1 %v1712_v19, %s1803_s27 }
  0x34   : > { %892 = vrot.lane.b32.xlu0 %v1713_v20, %s1803_s27  ;;  %941 = vrot.lane.b32.xlu1 %v1715_v21, %s1804_s18  ;;  %s1739_s27 = sshll.u32 %s2550_s16, 4 }
  0x35   : > { %s204_s30 = scalar_lea.vmem %s2547_s3, %s1739_s27 }
  0x38   : > { %920 = vrot.lane.b32.xlu0 %v1714_v22, %s1804_s18  ;;  %969 = vrot.lane.b32.xlu1 %v1716_v23, %s1804_s18 }
  0x3c   : > { %997 = vrot.lane.b32.xlu0 %v1717_v24, %s1804_s18  ;;  %1025 = vrot.lane.b32.xlu1 %v1718_v25, %s1804_s18 }
  0x40   : > { %1053 = vrot.lane.b32.xlu0 %v1719_v26, %s1804_s18  ;;  %1081 = vrot.lane.b32.xlu1 %v1720_v27, %s1804_s18 }
  0x44   : > { %1130 = vrot.lane.b32.xlu0 %v1722_v28, %s1805_s7  ;;  %1109 = vrot.lane.b32.xlu1 %v1721_v29, %s1805_s7 }
  0x48   : > { %1158 = vrot.lane.b32.xlu0 %v1723_v30, %s1805_s7  ;;  %1186 = vrot.lane.b32.xlu1 %v1724_v31, %s1805_s7 }
  0x4c   : > { %1214 = vrot.lane.b32.xlu0 %v1725_v32, %s1805_s7  ;;  %1242 = vrot.lane.b32.xlu1 %v1726_v33, %s1805_s7 }
  0x50   : > { %1270 = vrot.lane.b32.xlu0 %v1727_v34, %s1805_s7  ;;  %1319 = vrot.lane.b32.xlu1 %v1729_v35, %s1806_s24  ;;  %s1811_s7 = smov 108  }
  0x54   : > { %1375 = vrot.lane.b32.xlu0 %v1731_v36, %s1806_s24  ;;  %1298 = vrot.lane.b32.xlu1 %v1728_v37, %s1806_s24 }
  0x58   : > { %1431 = vrot.lane.b32.xlu0 %v1733_v38, %s1806_s24  ;;  %1347 = vrot.lane.b32.xlu1 %v1730_v39, %s1806_s24 }
  0x5c   : > { %1403 = vrot.lane.b32.xlu1 %v1732_v40, %s1806_s24 }
  0x60   : > { %1459 = vrot.lane.b32.xlu1 %v1734_v41, %s1806_s24 }
  0x7e   : > { %v375_v42 = vpop.permute.xlu0 %374  ;;  %v403_v43 = vpop.permute.xlu1 %402 }
  0x7f   : > { %v377_v54 = vmul.f32 %v375_v42, %v1985_v44  ;;  %v378_v55 = vmul.f32 %v375_v42, %v1988_v45  ;;  %v379_v56 = vmul.f32 %v375_v42, %v1995_v51  ;;  %v406_v57 = vmul.f32 %v403_v43, %v1988_v45 }
  0x80   : > { %v407_v58 = vmul.f32 %v403_v43, %v1995_v51  ;;  %v405_v60 = vmul.f32 %v403_v43, %v1985_v44 }
  0x81   : > { %v383_v63 = vrot.slane %v377_v54, 1  ;;  %v384_v0 = vrot.slane %v378_v55, 1  ;;  %v386_v1 = vrot.slane %v379_v56, 1  ;;  %v412_v2 = vrot.slane %v406_v57, 2 }
  0x82   : > { %v354_v46 = vpop.permute.xlu0 %353  ;;  %v431_v50 = vpop.permute.xlu1 %430  ;;  %v414_v3 = vrot.slane %v407_v58, 2  ;;  %v411_v8 = vrot.slane %v405_v60, 2 }
  0x83   : > { %v356_v47 = vmul.f32 %v354_v46, %v1985_v44  ;;  %v357_v48 = vmul.f32 %v354_v46, %v1988_v45  ;;  %v433_v5 = vmul.f32 %v431_v50, %v1985_v44  ;;  %v434_v6 = vmul.f32 %v431_v50, %v1988_v45 }
  0x84   : > { %v435_v7 = vmul.f32 %v431_v50, %v1995_v51  ;;  %v385_v9 = vsel %vm232_vm0, %v383_v63, %v384_v0  ;;  %v387_v10 = vsel %vm232_vm0, %v384_v0, %v386_v1  ;;  %v415_v11 = vsel %vm253_vm1, %v412_v2, %v414_v3 }
  0x85   : > { %362 = vrot.lane.b32.xlu1 %v357_v48, %s1807_s13  ;;  %360 = vrot.lane.b32.xlu0 %v356_v47, %s1807_s13  ;;  %v413_v12 = vsel %vm253_vm1, %v411_v8, %v412_v2  ;;  %v439_v13 = vrot.slane %v433_v5, 3  ;;  %v440_v14 = vrot.slane %v434_v6, 3 }
  0x86   : > { %v459_v49 = vpop.permute.xlu0 %458  ;;  %v487_v53 = vpop.permute.xlu1 %486  ;;  %v442_v15 = vrot.slane %v435_v7, 3 }
  0x87   : > { %v461_v16 = vmul.f32 %v459_v49, %v1985_v44  ;;  %v462_v18 = vmul.f32 %v459_v49, %v1988_v45  ;;  %v463_v19 = vmul.f32 %v459_v49, %v1995_v51  ;;  %v441_v20 = vsel %vm274_vm2, %v439_v13, %v440_v14 }
  0x88   : > { %v443_v21 = vsel %vm274_vm2, %v440_v14, %v442_v15  ;;  %v489_v22 = vmul.f32 %v487_v53, %v1985_v44  ;;  %v490_v23 = vmul.f32 %v487_v53, %v1988_v45  ;;  %v491_v34 = vmul.f32 %v487_v53, %v1995_v51 }
  0x89   : > { %v467_v24 = vrot.slane %v461_v16, 4  ;;  %v468_v28 = vrot.slane %v462_v18, 4  ;;  %v470_v29 = vrot.slane %v463_v19, 4 }
  0x8a   : > { %v1997_v52 = vpop.permute.xlu0 %514  ;;  %v564_v4 = vpop.permute.xlu1 %563  ;;  %v495_v32 = vrot.slane %v489_v22, 5  ;;  %v496_v33 = vrot.slane %v490_v23, 5  ;;  %v498_v50 = vrot.slane %v491_v34, 5 }
  0x8b   : > { %v518_v26 = vmul.f32 %v1997_v52, %v1988_v45  ;;  %v519_v27 = vmul.f32 %v1997_v52, %v1995_v51  ;;  %v567_v30 = vmul.f32 %v564_v4, %v1988_v45  ;;  %v568_v31 = vmul.f32 %v564_v4, %v1995_v51 }
  0x8c   : > { %v469_v36 = vsel %vm295_vm3, %v467_v24, %v468_v28  ;;  %v471_v37 = vsel %vm295_vm3, %v468_v28, %v470_v29  ;;  %v497_v42 = vsel %vm316_vm4, %v495_v32, %v496_v33  ;;  %v517_v48 = vmul.f32 %v1997_v52, %v1985_v44 }
  0x8d   : > { %v524_v38 = vrot.slane %v518_v26, 6  ;;  %v526_v39 = vrot.slane %v519_v27, 6  ;;  %v573_v40 = vrot.slane %v567_v30, 1  ;;  %v575_v41 = vrot.slane %v568_v31, 1 }
  0x8e   : > { %v543_v59 = vpop.permute.xlu0 %542  ;;  %v592_v17 = vpop.permute.xlu1 %591  ;;  %v566_v53 = vmul.f32 %v564_v4, %v1985_v44  ;;  %v499_v52 = vsel %vm316_vm4, %v496_v33, %v498_v50  ;;  %v523_v60 = vrot.slane %v517_v48, 6 }
  0x8f   : > { %v545_v61 = vmul.f32 %v543_v59, %v1985_v44  ;;  %v546_v62 = vmul.f32 %v543_v59, %v1988_v45  ;;  %v594_v43 = vmul.f32 %v592_v17, %v1985_v44  ;;  %v595_v46 = vmul.f32 %v592_v17, %v1988_v45 }
  0x90   : > { %v527_v49 = vsel %vm337_vm5, %v524_v38, %v526_v39  ;;  %v576_v54 = vsel %vm232_vm0, %v573_v40, %v575_v41  ;;  %v572_v63 = vrot.slane %v566_v53, 1  ;;  %v525_v6 = vsel %vm337_vm5, %v523_v60, %v524_v38 }
  0x91   : > { %549 = vrot.lane.b32.xlu1 %v545_v61, %s1808_s14  ;;  %551 = vrot.lane.b32.xlu0 %v546_v62, %s1808_s14  ;;  %v600_v58 = vrot.slane %v594_v43, 2  ;;  %v601_v59 = vrot.slane %v595_v46, 2  ;;  %v596_v61 = vmul.f32 %v592_v17, %v1995_v51 }
  0x92   : > { %v2027_v25 = vpop.permute.xlu1 %647  ;;  %v620_v47 = vpop.permute.xlu0 %619  ;;  %v574_v8 = vsel %vm232_vm0, %v572_v63, %v573_v40 }
  0x93   : > { %v623_v56 = vmul.f32 %v620_v47, %v1988_v45  ;;  %v624_v57 = vmul.f32 %v620_v47, %v1995_v51  ;;  %v651_v62 = vmul.f32 %v2027_v25, %v1988_v45  ;;  %v602_v0 = vsel %vm253_vm1, %v600_v58, %v601_v59 }
  0x94   : > { %v652_v1 = vmul.f32 %v2027_v25, %v1995_v51  ;;  %v622_v7 = vmul.f32 %v620_v47, %v1985_v44  ;;  %v650_v15 = vmul.f32 %v2027_v25, %v1985_v44 }
  0x95   : > { %388 = vrot.lane.b32.xlu1 %v385_v9, %s1807_s13  ;;  %390 = vrot.lane.b32.xlu0 %v387_v10, %s1807_s13  ;;  %v629_v2 = vrot.slane %v623_v56, 3  ;;  %v631_v3 = vrot.slane %v624_v57, 3  ;;  %v603_v10 = vrot.slane %v596_v61, 2  ;;  %v657_v13 = vrot.slane %v651_v62, 4 }
  0x96   : > { %v2038_v35 = vpop.permute.xlu1 %703  ;;  %v676_v4 = vpop.permute.xlu0 %675  ;;  %v659_v14 = vrot.slane %v652_v1, 4  ;;  %v628_v18 = vrot.slane %v622_v7, 3  ;;  %v656_v30 = vrot.slane %v650_v15, 4 }
  0x97   : > { %v679_v9 = vmul.f32 %v676_v4, %v1988_v45  ;;  %v604_v16 = vsel %vm253_vm1, %v601_v59, %v603_v10  ;;  %v707_v17 = vmul.f32 %v2038_v35, %v1988_v45  ;;  %v678_v25 = vmul.f32 %v676_v4, %v1985_v44 }
  0x98   : > { %v630_v26 = vsel %vm274_vm2, %v628_v18, %v629_v2  ;;  %v706_v32 = vmul.f32 %v2038_v35, %v1985_v44  ;;  %v658_v38 = vsel %vm295_vm3, %v656_v30, %v657_v13 }
  0x99   : > { %418 = vrot.lane.b32.xlu1 %v415_v11, %s1807_s13  ;;  %416 = vrot.lane.b32.xlu0 %v413_v12, %s1807_s13  ;;  %v632_v11 = vsel %vm274_vm2, %v629_v2, %v631_v3  ;;  %v680_v12 = vmul.f32 %v676_v4, %v1995_v51  ;;  %v685_v22 = vrot.slane %v679_v9, 5  ;;  %v713_v28 = vrot.slane %v707_v17, 6 }
  0x9a   : > { %v2054_v55 = vpop.permute.xlu1 %731  ;;  %v753_v24 = vpop.permute.xlu0 %752  ;;  %v684_v39 = vrot.slane %v678_v25, 5 }
  0x9b   : > { %v687_v23 = vrot.slane %v680_v12, 5  ;;  %v756_v33 = vmul.f32 %v753_v24, %v1988_v45  ;;  %v757_v34 = vmul.f32 %v753_v24, %v1995_v51  ;;  %v735_v40 = vmul.f32 %v2054_v55, %v1988_v45 }
  0x9c   : > { %v686_v47 = vsel %vm316_vm4, %v684_v39, %v685_v22  ;;  %v755_v50 = vmul.f32 %v753_v24, %v1985_v44  ;;  %v734_v61 = vmul.f32 %v2054_v55, %v1985_v44 }
  0x9d   : > { %444 = vrot.lane.b32.xlu1 %v441_v20, %s1807_s13  ;;  %446 = vrot.lane.b32.xlu0 %v443_v21, %s1807_s13  ;;  %v660_v20 = vsel %vm295_vm3, %v657_v13, %v659_v14  ;;  %v708_v21 = vmul.f32 %v2038_v35, %v1995_v51  ;;  %v688_v27 = vsel %vm316_vm4, %v685_v22, %v687_v23  ;;  %v762_v35 = vrot.slane %v756_v33, 1 }
  0x9e   : > { %v2067_v5 = vpop.permute.xlu1 %808  ;;  %v764_v41 = vrot.slane %v757_v34, 1 }
  0x9f   : > { %v715_v29 = vrot.slane %v708_v21, 6  ;;  %v812_v56 = vmul.f32 %v2067_v5, %v1988_v45  ;;  %v813_v57 = vmul.f32 %v2067_v5, %v1995_v51 }
  0xa0   : > { %v765_v53 = vsel %vm232_vm0, %v762_v35, %v764_v41 }
  0xa1   : > { %472 = vrot.lane.b32.xlu1 %v469_v36, %s1807_s13  ;;  %474 = vrot.lane.b32.xlu0 %v471_v37, %s1807_s13  ;;  %v781_v36 = vpop.permute.xlu0 %780  ;;  %v716_v37 = vsel %vm337_vm5, %v713_v28, %v715_v29  ;;  %v818_v3 = vrot.slane %v812_v56, 3  ;;  %v820_v4 = vrot.slane %v813_v57, 3 }
  0xa2   : > { %v2084_v19 = vpop.permute.xlu1 %864  ;;  %v784_v48 = vmul.f32 %v781_v36, %v1988_v45  ;;  %v783_v62 = vmul.f32 %v781_v36, %v1985_v44 }
  0xa3   : > { %v868_v55 = vmul.f32 %v2084_v19, %v1988_v45  ;;  %v821_v12 = vsel %vm274_vm2, %v818_v3, %v820_v4  ;;  %v867_v30 = vmul.f32 %v2084_v19, %v1985_v44 }
  0xa4   : > { %v790_v58 = vrot.slane %v784_v48, 2  ;;  %v1687_v48 = vld [vmem:[%s2545_s1 + $0x7] ss:$0 sm:$0xff] }
  0xa5   : > { %530 = vrot.lane.b32.xlu1 %v527_v49, %s1807_s13  ;;  %500 = vrot.lane.b32.xlu0 %v497_v42, %s1807_s13  ;;  %v712_v42 = vrot.slane %v706_v32, 6  ;;  %v837_v46 = vpop.permute.xlu0 %836  ;;  %v785_v49 = vmul.f32 %v781_v36, %v1995_v51  ;;  %v874_v21 = vrot.slane %v868_v55, 5  ;;  %v873_v39 = vrot.slane %v867_v30, 5 }
  0xa6   : > { %v2094_v31 = vpop.permute.xlu1 %941  ;;  %v840_v63 = vmul.f32 %v837_v46, %v1988_v45  ;;  %v841_v2 = vmul.f32 %v837_v46, %v1995_v51  ;;  %v839_v14 = vmul.f32 %v837_v46, %v1985_v44  ;;  %v227_v56 = vmul.f32 %v1687_v48, %v1988_v45 }
  0xa7   : > { %v792_v59 = vrot.slane %v785_v49, 2  ;;  %v944_v57 = vmul.f32 %v2094_v31, %v1985_v44 }
  0xa8   : > { %v848_v13 = vrot.slane %v841_v2, 4  ;;  %v845_v29 = vrot.slane %v839_v14, 4  ;;  %v234_v4 = vrot.slane %v227_v56, 1  ;;  %v1691_v56 = vld [vmem:[%s2545_s1 + $0x23] ss:$0 sm:$0xff] }
  0xa9   : > { %579 = vrot.lane.b32.xlu1 %v576_v54, %s1808_s14  ;;  %502 = vrot.lane.b32.xlu0 %v499_v52, %s1807_s13  ;;  %v714_v54 = vsel %vm337_vm5, %v712_v42, %v713_v28  ;;  %v893_v60 = vpop.permute.xlu0 %892  ;;  %v793_v1 = vsel %vm253_vm1, %v790_v58, %v792_v59 }
  0xaa   : > { %v2108_v43 = vpop.permute.xlu1 %969  ;;  %v896_v15 = vmul.f32 %v893_v60, %v1988_v45  ;;  %v897_v18 = vmul.f32 %v893_v60, %v1995_v51 }
  0xab   : > { %v2189_v49 = vmul.f32 %v2108_v43, %v1988_v45  ;;  %v972_v55 = vmul.f32 %v2108_v43, %v1985_v44 }
  0xac   : > { %v904_v28 = vrot.slane %v897_v18, 6 }
  0xad   : > { %605 = vrot.lane.b32.xlu1 %v602_v0, %s1808_s14  ;;  %528 = vrot.lane.b32.xlu0 %v525_v6, %s1807_s13  ;;  %v761_v0 = vrot.slane %v755_v50, 1  ;;  %v811_v6 = vmul.f32 %v2067_v5, %v1985_v44  ;;  %v2141_v10 = vpop.permute.xlu0 %920  ;;  %v846_v5 = vrot.slane %v840_v63, 4  ;;  %v974_v50 = vmul.f32 %v2108_v43, %v1995_v51 }
  0xae   : > { %v2122_v52 = vpop.permute.xlu1 %1025 }
  0xaf   : > { %v763_v7 = vsel %vm232_vm0, %v761_v0, %v762_v35  ;;  %v817_v17 = vrot.slane %v811_v6, 3  ;;  %v847_v36 = vsel %vm295_vm3, %v845_v29, %v846_v5  ;;  %v981_v63 = vrot.slane %v974_v50, 2 }
  0xb0   : > { %v226_v6 = vmul.f32 %v1687_v48, %v1985_v44  ;;  %v978_v29 = vrot.slane %v972_v55, 2 }
  0xb1   : > { %635 = vrot.lane.b32.xlu1 %v632_v11, %s1808_s14  ;;  %577 = vrot.lane.b32.xlu0 %v574_v8, %s1808_s14  ;;  %v789_v8 = vrot.slane %v783_v62, 2  ;;  %v869_v11 = vmul.f32 %v2084_v19, %v1995_v51  ;;  %v2155_v24 = vpop.permute.xlu0 %997  ;;  %v819_v25 = vsel %vm274_vm2, %v817_v17, %v818_v3  ;;  %v895_v19 = vmul.f32 %v893_v60, %v1985_v44  ;;  %v1688_v3 = vld [vmem:[%s2545_s1 + $0xe] ss:$0 sm:$0xff] }
  0xb2   : > { %v2139_v9 = vpop.permute.xlu1 %1081  ;;  %v2204_v60 = vmul.f32 %v2155_v24, %v1988_v45  ;;  %v979_v62 = vrot.slane %v2189_v49, 2  ;;  %v249_v43 = vmul.f32 %v1688_v3, %v1995_v51  ;;  %v1028_v49 = vmul.f32 %v2122_v52, %v1985_v44 }
  0xb3   : > { %v876_v22 = vrot.slane %v869_v11, 5  ;;  %v950_v11 = vrot.slane %v944_v57, 1  ;;  %v2273_v50 = vmul.f32 %v2139_v9, %v1988_v45  ;;  %v1086_v57 = vmul.f32 %v2139_v9, %v1995_v51 }
  0xb5   : > { %663 = vrot.lane.b32.xlu1 %v660_v20, %s1808_s14  ;;  %607 = vrot.lane.b32.xlu0 %v604_v16, %s1808_s14  ;;  %v791_v16 = vsel %vm253_vm1, %v789_v8, %v790_v58  ;;  %v849_v20 = vsel %vm295_vm3, %v846_v5, %v848_v13  ;;  %v2167_v33 = vpop.permute.xlu0 %1053  ;;  %v923_v8 = vmul.f32 %v2141_v10, %v1985_v44  ;;  %v1007_v13 = vrot.slane %v2204_v60, 3 }
  0xb6   : > { %v2153_v23 = vpop.permute.xlu1 %1109  ;;  %v982_v5 = vsel %vm253_vm1, %v979_v62, %v981_v63  ;;  %v1058_v30 = vmul.f32 %v2167_v33, %v1995_v51 }
  0xb9   : > { %691 = vrot.lane.b32.xlu1 %v688_v27, %s1808_s14  ;;  %633 = vrot.lane.b32.xlu0 %v630_v26, %s1808_s14  ;;  %v877_v26 = vsel %vm316_vm4, %v874_v21, %v876_v22  ;;  %v902_v27 = vrot.slane %v896_v15, 6  ;;  %v2182_v41 = vpop.permute.xlu0 %1130  ;;  %v1000_v22 = vmul.f32 %v2155_v24, %v1985_v44 }
  0xba   : > { %v2165_v32 = vpop.permute.xlu1 %1186 }
  0xbb   : > { %v905_v34 = vsel %vm337_vm5, %v902_v27, %v904_v28 }
  0xbd   : > { %719 = vrot.lane.b32.xlu1 %v716_v37, %s1808_s14  ;;  %661 = vrot.lane.b32.xlu0 %v658_v38, %s1808_s14  ;;  %v945_v37 = vmul.f32 %v2094_v31, %v1988_v45  ;;  %v946_v38 = vmul.f32 %v2094_v31, %v1995_v51  ;;  %v2213_v31 = vpop.permute.xlu0 %1158 }
  0xbe   : > { %v2180_v35 = vpop.permute.xlu1 %1242 }
  0xbf   : > { %v951_v42 = vrot.slane %v945_v37, 1  ;;  %v953_v46 = vrot.slane %v946_v38, 1 }
  0xc1   : > { %740 = vrot.lane.b32.xlu1 %v735_v40, %s1809_s17  ;;  %689 = vrot.lane.b32.xlu0 %v686_v47, %s1808_s14  ;;  %v924_v40 = vmul.f32 %v2141_v10, %v1988_v45  ;;  %v901_v47 = vrot.slane %v895_v19, 6  ;;  %v954_v58 = vsel %vm232_vm0, %v951_v42, %v953_v46  ;;  %v1689_v10 = vld [vmem:[%s2545_s1 + $0x15] ss:$0 sm:$0xff]  ;;  %v952_v28 = vsel %vm232_vm0, %v950_v11, %v951_v42 }
  0xc2   : > { %v2211_v0 = vpop.permute.xlu1 %1319  ;;  %v270_v38 = vmul.f32 %v1689_v10, %v1995_v51  ;;  %v269_v42 = vmul.f32 %v1689_v10, %v1988_v45 }
  0xc3   : > { %v903_v59 = vsel %vm337_vm5, %v901_v47, %v902_v27  ;;  %v2253_v27 = vpop.permute.xlu0 %1214 }
  0xc5   : > { %768 = vrot.lane.b32.xlu1 %v765_v53, %s1809_s17  ;;  %717 = vrot.lane.b32.xlu0 %v714_v54, %s1808_s14  ;;  %v875_v53 = vsel %vm316_vm4, %v873_v39, %v874_v21  ;;  %v228_v54 = vmul.f32 %v1687_v48, %v1995_v51  ;;  %v247_v21 = vmul.f32 %v1688_v3, %v1985_v44 }
  0xc6   : > { %v268_v48 = vmul.f32 %v1689_v10, %v1985_v44 }
  0xc7   : > { %v236_v2 = vrot.slane %v228_v54, 1  ;;  %v254_v47 = vrot.slane %v247_v21, 2  ;;  %v1006_v54 = vrot.slane %v1000_v22, 3 }
  0xc9   : > { %796 = vrot.lane.b32.xlu1 %v793_v1, %s1809_s17  ;;  %738 = vrot.lane.b32.xlu0 %v734_v61, %s1809_s17  ;;  %v1002_v61 = vmul.f32 %v2155_v24, %v1995_v51  ;;  %v1686_v1 = vld [vmem:[%s2545_s1] ss:$0 sm:$0xff]  ;;  %v237_v17 = vsel %vm232_vm0, %v234_v4, %v236_v2  ;;  %v257_v24 = vrot.slane %v249_v43, 2  ;;  %v1008_v11 = vsel %vm274_vm2, %v1006_v54, %v1007_v13 }
  0xca   : > { %v218_v15 = vmul.f32 %v1686_v1, %v1988_v45  ;;  %v217_v18 = vmul.f32 %v1686_v1, %v1985_v44  ;;  %v1091_v43 = vrot.slane %v2273_v50, 6 }
  0xcb   : > { %v1009_v14 = vrot.slane %v1002_v61, 3  ;;  %v2287_v61 = vpop.permute.xlu0 %1270 }
  0xcc   : > { %v241_v19 = vadd.f32 %v237_v17, %v218_v15  ;;  %v1093_v15 = vrot.slane %v1086_v57, 6 }
  0xcd   : > { %824 = vrot.lane.b32.xlu1 %v821_v12, %s1809_s17  ;;  %766 = vrot.lane.b32.xlu0 %v763_v7, %s1809_s17  ;;  %v2226_v7 = vmul.f32 %v2122_v52, %v1988_v45  ;;  %v1030_v12 = vmul.f32 %v2122_v52, %v1995_v51 }
  0xcf   : > { %v1037_v37 = vrot.slane %v1030_v12, 4 }
  0xd1   : > { %852 = vrot.lane.b32.xlu1 %v849_v20, %s1809_s17  ;;  %794 = vrot.lane.b32.xlu0 %v791_v16, %s1809_s17  ;;  %v248_v16 = vmul.f32 %v1688_v3, %v1988_v45  ;;  %v233_v20 = vrot.slane %v226_v6, 1  ;;  %v312_v3 = vmul.f32 %v1691_v56, %v1995_v51 }
  0xd3   : > { %v255_v39 = vrot.slane %v248_v16, 2  ;;  %v235_v46 = vsel %vm232_vm0, %v233_v20, %v234_v4  ;;  %v276_v4 = vrot.slane %v269_v42, 3  ;;  %v1034_v16 = vrot.slane %v1028_v49, 4 }
  0xd4   : > { %v240_v6 = vadd.f32 %v235_v46, %v217_v18  ;;  %v320_v20 = vrot.slane %v312_v3, 5 }
  0xd5   : > { %880 = vrot.lane.b32.xlu1 %v877_v26, %s1809_s17  ;;  %822 = vrot.lane.b32.xlu0 %v819_v25, %s1809_s17  ;;  %v2249_v25 = vmul.f32 %v2167_v33, %v1988_v45  ;;  %v2251_v26 = vpop.permute.xlu1 %1298  ;;  %v258_v1 = vsel %vm253_vm1, %v255_v39, %v257_v24  ;;  %v256_v12 = vsel %vm253_vm1, %v254_v47, %v255_v39 }
  0xd6   : > { %v262_v17 = vadd.f32 %v258_v1, %v241_v19  ;;  %v261_v22 = vadd.f32 %v256_v12, %v240_v6  ;;  %v1135_v19 = vmul.f32 %v2182_v41, %v1995_v51  ;;  %v1094_v39 = vsel %vm337_vm5, %v1091_v43, %v1093_v15 }
  0xd7   : > { %v1063_v52 = vrot.slane %v2249_v25, 5 }
  0xd9   : > { %908 = vrot.lane.b32.xlu1 %v905_v34, %s1809_s17  ;;  %850 = vrot.lane.b32.xlu0 %v847_v36, %s1809_s17  ;;  %v1010_v34 = vsel %vm274_vm2, %v1007_v13, %v1009_v14  ;;  %v1035_v36 = vrot.slane %v2226_v7, 4  ;;  %v2285_v60 = vpop.permute.xlu1 %1347  ;;  %v1692_v13 = vld [vmem:[%s2545_s1 + $0x2a] ss:$0 sm:$0xff]  ;;  %v1113_v7 = vmul.f32 %v2153_v23, %v1988_v45 }
  0xdd   : > { %929 = vrot.lane.b32.xlu1 %v924_v40, %s1810_s20  ;;  %878 = vrot.lane.b32.xlu0 %v875_v53, %s1809_s17  ;;  %v1690_v40 = vld [vmem:[%s2545_s1 + $0x1c] ss:$0 sm:$0xff]  ;;  %v980_v53 = vsel %vm253_vm1, %v978_v29, %v979_v62  ;;  %v278_v62 = vrot.slane %v270_v38, 3  ;;  %v2311_v29 = vpop.permute.xlu1 %1403  ;;  %v2319_v38 = vmul.f32 %v2182_v41, %v1988_v45 }
  0xde   : > { %v291_v63 = vmul.f32 %v1690_v40, %v1995_v51  ;;  %v290_v2 = vmul.f32 %v1690_v40, %v1988_v45  ;;  %v289_v55 = vmul.f32 %v1690_v40, %v1985_v44  ;;  %v333_v40 = vmul.f32 %v1692_v13, %v1995_v51 }
  0xdf   : > { %v279_v21 = vsel %vm274_vm2, %v276_v4, %v278_v62  ;;  %v1140_v57 = vrot.slane %v2319_v38, 1  ;;  %v1163_v62 = vmul.f32 %v2213_v31, %v1995_v51 }
  0xe0   : > { %v299_v10 = vrot.slane %v291_v63, 4  ;;  %v297_v18 = vrot.slane %v290_v2, 4  ;;  %v296_v25 = vrot.slane %v289_v55, 4  ;;  %v283_v42 = vadd.f32 %v279_v21, %v262_v17 }
  0xe1   : > { %957 = vrot.lane.b32.xlu1 %v954_v58, %s1810_s20  ;;  %906 = vrot.lane.b32.xlu0 %v903_v59, %s1809_s17  ;;  %v1038_v58 = vsel %vm295_vm3, %v1035_v36, %v1037_v37  ;;  %v1065_v59 = vrot.slane %v1058_v30, 5  ;;  %v2313_v30 = vpop.permute.xlu0 %1375  ;;  %v310_v37 = vmul.f32 %v1691_v56, %v1985_v44  ;;  %v2344_v63 = vpop.permute.xlu1 %1459  ;;  %v341_v2 = vrot.slane %v333_v40, 6 }
  0xe2   : > { %v300_v46 = vsel %vm295_vm3, %v297_v18, %v299_v10  ;;  %v298_v50 = vsel %vm295_vm3, %v296_v25, %v297_v18  ;;  %v1161_v21 = vmul.f32 %v2213_v31, %v1985_v44 }
  0xe3   : > { %v1066_v14 = vsel %vm316_vm4, %v1063_v52, %v1065_v59  ;;  %v2340_v59 = vmul.f32 %v2213_v31, %v1988_v45  ;;  %v304_v3 = vadd.f32 %v300_v46, %v283_v42 }
  0xe5   : > { %985 = vrot.lane.b32.xlu1 %v982_v5, %s1810_s20  ;;  %927 = vrot.lane.b32.xlu0 %v923_v8, %s1810_s20  ;;  %v1056_v8 = vmul.f32 %v2167_v33, %v1985_v44  ;;  %v275_v5 = vrot.slane %v268_v48, 3  ;;  %v311_v33 = vmul.f32 %v1691_v56, %v1988_v45  ;;  %v332_v48 = vmul.f32 %v1692_v13, %v1988_v45  ;;  %v2346_v1 = vpop.permute.xlu0 %1431 }
  0xe6   : > { %v1168_v15 = vrot.slane %v2340_v59, 2 }
  0xe7   : > { %v1062_v24 = vrot.slane %v1056_v8, 5  ;;  %v318_v47 = vrot.slane %v311_v33, 5  ;;  %v2353_v8 = vmul.f32 %v2165_v32, %v1988_v45 }
  0xe9   : > { %1013 = vrot.lane.b32.xlu1 %v1010_v34, %s1810_s20  ;;  %955 = vrot.lane.b32.xlu0 %v952_v28, %s1810_s20  ;;  %v1084_v28 = vmul.f32 %v2139_v9, %v1985_v44  ;;  %v277_v34 = vsel %vm274_vm2, %v275_v5, %v276_v4  ;;  %v1036_v9 = vsel %vm295_vm3, %v1034_v16, %v1035_v36  ;;  %v317_v36 = vrot.slane %v310_v37, 5 }
  0xea   : > { %v282_v49 = vadd.f32 %v277_v34, %v261_v22  ;;  %v1064_v54 = vsel %vm316_vm4, %v1062_v24, %v1063_v52  ;;  %v321_v52 = vsel %vm316_vm4, %v318_v47, %v320_v20  ;;  %v339_v4 = vrot.slane %v332_v48, 6 }
  0xeb   : > { %v1090_v56 = vrot.slane %v1084_v28, 6  ;;  %v319_v12 = vsel %vm316_vm4, %v317_v36, %v318_v47  ;;  %v1170_v16 = vrot.slane %v1163_v62, 2  ;;  %v325_v17 = vadd.f32 %v321_v52, %v304_v3 }
  0xec   : > { %v303_v6 = vadd.f32 %v298_v50, %v282_v49  ;;  %v342_v18 = vsel %vm337_vm5, %v339_v4, %v341_v2  ;;  %v1196_v20 = vrot.slane %v2353_v8, 3  ;;  %v1218_v34 = vmul.f32 %v2253_v27, %v1988_v45 }
  0xed   : > { %1041 = vrot.lane.b32.xlu1 %v1038_v58, %s1810_s20  ;;  %983 = vrot.lane.b32.xlu0 %v980_v53, %s1810_s20  ;;  %v331_v53 = vmul.f32 %v1692_v13, %v1985_v44  ;;  %v1142_v58 = vrot.slane %v1135_v19, 1  ;;  %v1092_v5 = vsel %vm337_vm5, %v1090_v56, %v1091_v43  ;;  %v1112_v43 = vmul.f32 %v2153_v23, %v1985_v44 }
  0xee   : > { %v1219_v37 = vmul.f32 %v2253_v27, %v1995_v51  ;;  %v1171_v24 = vsel %vm253_vm1, %v1168_v15, %v1170_v16  ;;  %v1189_v23 = vmul.f32 %v2165_v32, %v1985_v44  ;;  %v346_v38 = vadd.f32 %v342_v18, %v325_v17 }
  0xef   : > { %v338_v55 = vrot.slane %v331_v53, 6  ;;  %v1143_v10 = vsel %vm232_vm0, %v1140_v57, %v1142_v58  ;;  %v1246_v19 = vmul.f32 %v2180_v35, %v1988_v45  ;;  %v1224_v46 = vrot.slane %v1218_v34, 4 }
  0xf0   : > { %v1226_v47 = vrot.slane %v1219_v37, 4  ;;  %v1217_v50 = vmul.f32 %v2253_v27, %v1985_v44  ;;  %v1274_v56 = vmul.f32 %v2287_v61, %v1988_v45  ;;  %v1245_v27 = vmul.f32 %v2180_v35, %v1985_v44 }
  0xf1   : > { %1069 = vrot.lane.b32.xlu1 %v1066_v14, %s1810_s20  ;;  %1011 = vrot.lane.b32.xlu0 %v1008_v11, %s1810_s20  ;;  %v1133_v11 = vmul.f32 %v2182_v41, %v1985_v44  ;;  %v1191_v14 = vmul.f32 %v2165_v32, %v1995_v51  ;;  %v324_v41 = vadd.f32 %v319_v12, %v303_v6  ;;  %v1195_v32 = vrot.slane %v1189_v23, 3 }
  0xf2   : > { %v340_v33 = vsel %vm337_vm5, %v338_v55, %v339_v4  ;;  %v1252_v36 = vrot.slane %v1246_v19, 5  ;;  %v1227_v52 = vsel %vm295_vm3, %v1224_v46, %v1226_v47  ;;  %v1223_v4 = vrot.slane %v1217_v50, 4 }
  0xf3   : > { %v1139_v13 = vrot.slane %v1133_v11, 1  ;;  %v1198_v28 = vrot.slane %v1191_v14, 3  ;;  %v345_v31 = vadd.f32 %v340_v33, %v324_v41  ;;  %v1280_v6 = vrot.slane %v1274_v56, 6 }
  0xf4   : > { %v1197_v11 = vsel %vm274_vm2, %v1195_v32, %v1196_v20  ;;  %v1273_v16 = vmul.f32 %v2287_v61, %v1985_v44  ;;  %v1324_v17 = vmul.f32 %v2211_v0, %v1995_v51  ;;  %v1352_v23 = vmul.f32 %v2285_v60, %v1995_v51 }
  0xf5   : > { %1097 = vrot.lane.b32.xlu1 %v1094_v39, %s1810_s20  ;;  %1039 = vrot.lane.b32.xlu0 %v1036_v9, %s1810_s20  ;;  %v1247_v39 = vmul.f32 %v2180_v35, %v1995_v51  ;;  %v1167_v9 = vrot.slane %v1161_v21, 2  ;;  %v1199_v48 = vsel %vm274_vm2, %v1196_v20, %v1198_v28  ;;  %v1141_v49 = vsel %vm232_vm0, %v1139_v13, %v1140_v57 }
  0xf6   : > { %v1275_v57 = vmul.f32 %v2287_v61, %v1995_v51  ;;  %v1323_v35 = vmul.f32 %v2211_v0, %v1988_v45  ;;  %v1225_v13 = vsel %vm295_vm3, %v1223_v4, %v1224_v46  ;;  %v1279_v61 = vrot.slane %v1273_v16, 6 }
  0xf7   : > { %v363_v22 = vpop.permute.xlu1 %362  ;;  %v361_v25 = vpop.permute.xlu0 %360  ;;  %v1169_v62 = vsel %vm253_vm1, %v1167_v9, %v1168_v15  ;;  %v1322_v19 = vmul.f32 %v2211_v0, %v1985_v44  ;;  %v1380_v9 = vmul.f32 %v2313_v30, %v1995_v51  ;;  %v1359_v32 = vrot.slane %v1352_v23, 2  ;;  %v1488_v0 = vld [vmem:[%s2546_s2 + $0x38] sm:$0xff] }
  0xf8   : > { %v367_v53 = vadd.f32 %v363_v22, %v346_v38  ;;  %v1282_v12 = vrot.slane %v1275_v57, 6  ;;  %v1329_v21 = vrot.slane %v1323_v35, 1  ;;  %v1331_v22 = vrot.slane %v1324_v17, 1  ;;  %1750 = vmatprep.subr.mxu0 %v1488_v0  ;;  %v1790_v17 = vld [vmem:[%s1982_s12] sm:$0xff] }
  0xf9   : > { %1118 = vrot.lane.b32.xlu1 %v1113_v7, %s1811_s7  ;;  %1067 = vrot.lane.b32.xlu0 %v1064_v54, %s1810_s20  ;;  %v366_v7 = vadd.f32 %v361_v25, %v345_v31  ;;  %v1254_v54 = vrot.slane %v1247_v39, 5  ;;  %v1302_v25 = vmul.f32 %v2251_v26, %v1988_v45  ;;  %v2434_v39 = vmul.f32 %v2313_v30, %v1988_v45 }
  0xfa   : > { %v1283_v20 = vsel %vm337_vm5, %v1280_v6, %v1282_v12  ;;  %1751 = vmatpush3.msra.mxu0 %v1488_v0  ;;  %v2453_v57 = vmul.f32 %v2311_v29, %v1988_v45 }
  0xfb   : > { %v1255_v15 = vsel %vm316_vm4, %v1252_v36, %v1254_v54  ;;  %v1350_v54 = vmul.f32 %v2285_v60, %v1985_v44  ;;  %v1385_v56 = vrot.slane %v2434_v39, 3 }
  0xfd   : > { %1146 = vrot.lane.b32.xlu1 %v1143_v10, %s1811_s7  ;;  %1095 = vrot.lane.b32.xlu0 %v1092_v5, %s1810_s20  ;;  %v1251_v10 = vrot.slane %v1245_v27, 5  ;;  %v1378_v27 = vmul.f32 %v2313_v30, %v1985_v44 }
  0xff   : > { %v1253_v37 = vsel %vm316_vm4, %v1251_v10, %v1252_v36  ;;  %v1301_v36 = vmul.f32 %v2251_v26, %v1985_v44  ;;  %v1487_v26 = vld [vmem:[%s2546_s2 + $0x30] sm:$0xff]  ;;  %v1413_v44 = vrot.slane %v2453_v57, 4 }
 0x100   : > { %1752 = vmatprep.subr.mxu0 %v1487_v26 }
 0x101   : > { %1174 = vrot.lane.b32.xlu1 %v1171_v24, %s1811_s7  ;;  %1116 = vrot.lane.b32.xlu0 %v1112_v43, %s1811_s7  ;;  %v2424_v24 = vmul.f32 %v2285_v60, %v1988_v45  ;;  %v1486_v60 = vld [vmem:[%s2546_s2 + $0x28] sm:$0xff] }
 0x102   : > { %1753 = vmatpush3.msra.mxu0 %v1487_v26 }
 0x103   : > { %v2385_v40 = vpop.permute.xlu1 %549  ;;  %v2387_v42 = vpop.permute.xlu0 %551  ;;  %1754 = vmatprep.subr.mxu0 %v1486_v60 }
 0x104   : > { %1755 = vmatpush3.msra.mxu0 %v1486_v60 }
 0x105   : > { %1202 = vrot.lane.b32.xlu1 %v1199_v48, %s1811_s7  ;;  %1144 = vrot.lane.b32.xlu0 %v1141_v49, %s1811_s7  ;;  %v1281_v48 = vsel %vm337_vm5, %v1279_v61, %v1280_v6  ;;  %v1357_v49 = vrot.slane %v2424_v24, 2  ;;  %v1791_v61 = vld [vmem:[%s1982_s12 + $0x8] sm:$0xff] }
 0x107   : > { %v389_v58 = vpop.permute.xlu1 %388  ;;  %v391_v59 = vpop.permute.xlu0 %390 }
 0x108   : > { %v394_v2 = vadd.f32 %v389_v58, %v366_v7  ;;  %v395_v3 = vadd.f32 %v391_v59, %v367_v53  ;;  %v1332_v53 = vsel %vm232_vm0, %v1329_v21, %v1331_v22  ;;  %v1328_v7 = vrot.slane %v1322_v19, 1 }
 0x109   : > { %1230 = vrot.lane.b32.xlu1 %v1227_v52, %s1811_s7  ;;  %1172 = vrot.lane.b32.xlu0 %v1169_v62, %s1811_s7  ;;  %v1387_v58 = vrot.slane %v1380_v9, 3  ;;  %v1360_v52 = vsel %vm253_vm1, %v1357_v49, %v1359_v32 }
 0x10a   : > { %v1330_v6 = vsel %vm232_vm0, %v1328_v7, %v1329_v21  ;;  %v1792_v21 = vld [vmem:[%s1982_s12 + $0x10] sm:$0x3f] }
 0x10b   : > { %v419_v55 = vpop.permute.xlu1 %418  ;;  %v417_v8 = vpop.permute.xlu0 %416  ;;  %v1464_v22 = vmul.f32 %v1792_v21, %v2344_v63 }
 0x10c   : > { %v423_v5 = vadd.f32 %v419_v55, %v395_v3  ;;  %v422_v14 = vadd.f32 %v417_v8, %v394_v2  ;;  %v1408_v2 = vmul.f32 %v2311_v29, %v1995_v51  ;;  %v1356_v55 = vrot.slane %v1350_v54, 2 }
 0x10d   : > { %1258 = vrot.lane.b32.xlu1 %v1255_v15, %s1811_s7  ;;  %1200 = vrot.lane.b32.xlu0 %v1197_v11, %s1811_s7  ;;  %v2471_v8 = vmul.f32 %v2346_v1, %v1988_v45  ;;  %v1436_v11 = vmul.f32 %v2346_v1, %v1995_v51  ;;  %v1485_v45 = vld [vmem:[%s2546_s2 + $0x20] sm:$0xff]  ;;  %v1384_v51 = vrot.slane %v1378_v27, 3  ;;  %v1471_v39 = vrot.slane %v1464_v22, 6 }
 0x10e   : > { %v1415_v30 = vrot.slane %v1408_v2, 4  ;;  %1756 = vmatprep.subr.mxu0 %v1485_v45 }
 0x10f   : > { %v445_v18 = vpop.permute.xlu1 %444  ;;  %v447_v41 = vpop.permute.xlu0 %446  ;;  %1757 = vmatpush3.msra.mxu0 %v1485_v45 }
 0x110   : > { %v450_v33 = vadd.f32 %v445_v18, %v422_v14  ;;  %v451_v43 = vadd.f32 %v447_v41, %v423_v5  ;;  %v1388_v14 = vsel %vm274_vm2, %v1385_v56, %v1387_v58  ;;  %v1441_v18 = vrot.slane %v2471_v8, 5 }
 0x111   : > { %1286 = vrot.lane.b32.xlu1 %v1283_v20, %s1811_s7  ;;  %1228 = vrot.lane.b32.xlu0 %v1225_v13, %s1811_s7  ;;  %v1443_v41 = vrot.slane %v1436_v11, 5  ;;  %v1358_v20 = vsel %vm253_vm1, %v1356_v55, %v1357_v49  ;;  %v1484_v13 = vld [vmem:[%s2546_s2 + $0x18] sm:$0xff]  ;;  %v1462_v49 = vmul.f32 %v1790_v17, %v2344_v63 }
 0x112   : > { %1758 = vmatprep.subr.mxu0 %v1484_v13 }
 0x113   : > { %v473_v28 = vpop.permute.xlu1 %472  ;;  %v475_v34 = vpop.permute.xlu0 %474  ;;  %v1444_v23 = vsel %vm316_vm4, %v1441_v18, %v1443_v41  ;;  %1759 = vmatpush3.msra.mxu0 %v1484_v13 }
 0x114   : > { %v478_v38 = vadd.f32 %v473_v28, %v450_v33  ;;  %v479_v31 = vadd.f32 %v475_v34, %v451_v43  ;;  %v1483_v28 = vld [vmem:[%s2546_s2 + $0x10] sm:$0xff]  ;;  %v1434_v34 = vmul.f32 %v1790_v17, %v2346_v1 }
 0x115   : > { %1307 = vrot.lane.b32.xlu1 %v1302_v25, %s1812_s8  ;;  %1256 = vrot.lane.b32.xlu0 %v1253_v37, %s1811_s7  ;;  %v1416_v25 = vsel %vm295_vm3, %v1413_v44, %v1415_v30 }
 0x116   : > { %1760 = vmatprep.subr.mxu0 %v1483_v28  ;;  %v1440_v32 = vrot.slane %v1434_v34, 5 }
 0x117   : > { %v531_v46 = vpop.permute.xlu1 %530  ;;  %v501_v47 = vpop.permute.xlu0 %500  ;;  %1761 = vmatpush3.msra.mxu0 %v1483_v28 }
 0x118   : > { %v506_v50 = vadd.f32 %v501_v47, %v478_v38  ;;  %v1386_v38 = vsel %vm274_vm2, %v1384_v51, %v1385_v56  ;;  %v1442_v54 = vsel %vm316_vm4, %v1440_v32, %v1441_v18 }
 0x119   : > { %1335 = vrot.lane.b32.xlu1 %v1332_v53, %s1812_s8  ;;  %1284 = vrot.lane.b32.xlu0 %v1281_v48, %s1811_s7  ;;  %v1481_v48 = vld [vmem:[%s2546_s2] sm:$0xff] }
 0x11b   : > { %v580_v59 = vpop.permute.xlu1 %579  ;;  %v503_v62 = vpop.permute.xlu0 %502 }
 0x11c   : > { %v507_v3 = vadd.f32 %v503_v62, %v479_v31 }
 0x11d   : > { %1363 = vrot.lane.b32.xlu1 %v1360_v52, %s1812_s8  ;;  %1305 = vrot.lane.b32.xlu0 %v1301_v36, %s1812_s8  ;;  %v1468_v36 = vrot.slane %v1462_v49, 6 }
 0x11e   : > { %v535_v4 = vadd.f32 %v531_v46, %v507_v3  ;;  %v1482_v46 = vld [vmem:[%s2546_s2 + $0x8] sm:$0xff] }
 0x11f   : > { %v2475_v12 = vpop.permute.xlu1 %605  ;;  %v529_v5 = vpop.permute.xlu0 %528  ;;  %1762 = vmatprep.subr.mxu0 %v1482_v46 }
 0x120   : > { %v556_v15 = vadd.f32 %v2387_v42, %v535_v4  ;;  %v534_v16 = vadd.f32 %v529_v5, %v506_v50  ;;  %v1406_v42 = vmul.f32 %v1790_v17, %v2311_v29  ;;  %1763 = vmatpush3.msra.mxu0 %v1482_v46 }
 0x121   : > { %1391 = vrot.lane.b32.xlu1 %v1388_v14, %s1812_s8  ;;  %1333 = vrot.lane.b32.xlu0 %v1330_v6, %s1812_s8 }
 0x122   : > { %v584_v10 = vadd.f32 %v580_v59, %v556_v15  ;;  %v555_v35 = vadd.f32 %v2385_v40, %v534_v16  ;;  %v1463_v40 = vmul.f32 %v1791_v61, %v2344_v63  ;;  %v1412_v31 = vrot.slane %v1406_v42, 4  ;;  %1764 = vmatprep.subr.mxu0 %v1481_v48 }
 0x123   : > { %v2489_v33 = vpop.permute.xlu1 %635  ;;  %v578_v43 = vpop.permute.xlu0 %577  ;;  %1765 = vmatpush3.msra.mxu0 %v1481_v48 }
 0x124   : > { %v2499_v29 = vadd.f32 %v578_v43, %v555_v35  ;;  %v1469_v19 = vrot.slane %v1463_v40, 6  ;;  %v1414_v53 = vsel %vm295_vm3, %v1412_v31, %v1413_v44 }
 0x125   : > { %1419 = vrot.lane.b32.xlu1 %v1416_v25, %s1812_s8  ;;  %1361 = vrot.lane.b32.xlu0 %v1358_v20, %s1812_s8 }
 0x126   : > { %v1472_v50 = vsel %vm337_vm5, %v1469_v19, %v1471_v39  ;;  %v1470_v58 = vsel %vm337_vm5, %v1468_v36, %v1469_v19  ;;  %v611_v41 = vadd.f32 %v2475_v12, %v2499_v29 }
 0x127   : > { %v2508_v37 = vpop.permute.xlu1 %663  ;;  %v608_v24 = vpop.permute.xlu0 %607 }
 0x128   : > { %v612_v9 = vadd.f32 %v608_v24, %v584_v10 }
 0x129   : > { %1447 = vrot.lane.b32.xlu1 %v1444_v23, %s1812_s8  ;;  %1389 = vrot.lane.b32.xlu0 %v1386_v38, %s1812_s8 }
 0x12a   : > { %v640_v17 = vadd.f32 %v2489_v33, %v612_v9 }
 0x12b   : > { %v692_v1 = vpop.permute.xlu1 %691  ;;  %v634_v47 = vpop.permute.xlu0 %633 }
 0x12c   : > { %v668_v43 = vadd.f32 %v2508_v37, %v640_v17  ;;  %v639_v20 = vadd.f32 %v634_v47, %v611_v41 }
 0x12d   : > { %1475 = vrot.lane.b32.xlu1 %v1472_v50, %s1812_s8  ;;  %1417 = vrot.lane.b32.xlu0 %v1414_v53, %s1812_s8 }
 0x12e   : > { %v696_v21 = vadd.f32 %v692_v1, %v668_v43 }
 0x12f   : > { %v720_v0 = vpop.permute.xlu1 %719  ;;  %v662_v7 = vpop.permute.xlu0 %661 }
 0x130   : > { %v667_v40 = vadd.f32 %v662_v7, %v639_v20  ;;  %v724_v24 = vadd.f32 %v720_v0, %v696_v21 }
 0x131   : > { %1445 = vrot.lane.b32.xlu0 %v1442_v54, %s1812_s8 }
 0x133   : > { %v741_v63 = vpop.permute.xlu1 %740  ;;  %v690_v56 = vpop.permute.xlu0 %689 }
 0x134   : > { %v695_v22 = vadd.f32 %v690_v56, %v667_v40  ;;  %v745_v38 = vadd.f32 %v741_v63, %v724_v24 }
 0x135   : > { %1473 = vrot.lane.b32.xlu0 %v1470_v58, %s1812_s8  ;;  %s208_s8 = scalar_lea.vmem %s2548_s4, %s1685_s5 }
 0x137   : > { %v769_v59 = vpop.permute.xlu1 %768  ;;  %v718_v62 = vpop.permute.xlu0 %717 }
 0x138   : > { %v723_v34 = vadd.f32 %v718_v62, %v695_v22  ;;  %v773_v39 = vadd.f32 %v769_v59, %v745_v38 }
 0x13b   : > { %v797_v57 = vpop.permute.xlu1 %796  ;;  %v739_v2 = vpop.permute.xlu0 %738 }
 0x13c   : > { %v744_v23 = vadd.f32 %v739_v2, %v723_v34  ;;  %v801_v12 = vadd.f32 %v797_v57, %v773_v39 }
 0x13f   : > { %v825_v3 = vpop.permute.xlu1 %824  ;;  %v767_v52 = vpop.permute.xlu0 %766 }
 0x140   : > { %v772_v19 = vadd.f32 %v767_v52, %v744_v23  ;;  %v829_v47 = vadd.f32 %v825_v3, %v801_v12 }
 0x143   : > { %v853_v26 = vpop.permute.xlu1 %852  ;;  %v795_v60 = vpop.permute.xlu0 %794 }
 0x144   : > { %v800_v9 = vadd.f32 %v795_v60, %v772_v19  ;;  %v857_v49 = vadd.f32 %v853_v26, %v829_v47 }
 0x147   : > { %v881_v27 = vpop.permute.xlu1 %880  ;;  %v823_v4 = vpop.permute.xlu0 %822 }
 0x148   : > { %v828_v46 = vadd.f32 %v823_v4, %v800_v9  ;;  %v885_v53 = vadd.f32 %v881_v27, %v857_v49 }
 0x14b   : > { %v909_v6 = vpop.permute.xlu1 %908  ;;  %v851_v55 = vpop.permute.xlu0 %850 }
 0x14c   : > { %v856_v48 = vadd.f32 %v851_v55, %v828_v46  ;;  %v913_v0 = vadd.f32 %v909_v6, %v885_v53 }
 0x14f   : > { %v930_v8 = vpop.permute.xlu1 %929  ;;  %v879_v11 = vpop.permute.xlu0 %878 }
 0x150   : > { %v884_v50 = vadd.f32 %v879_v11, %v856_v48  ;;  %v934_v56 = vadd.f32 %v930_v8, %v913_v0 }
 0x153   : > { %v958_v5 = vpop.permute.xlu1 %957  ;;  %v907_v14 = vpop.permute.xlu0 %906 }
 0x154   : > { %v912_v7 = vadd.f32 %v907_v14, %v884_v50  ;;  %v962_v59 = vadd.f32 %v958_v5, %v934_v56 }
 0x157   : > { %v986_v44 = vpop.permute.xlu1 %985  ;;  %v928_v30 = vpop.permute.xlu0 %927 }
 0x158   : > { %v933_v63 = vadd.f32 %v928_v30, %v912_v7  ;;  %v990_v52 = vadd.f32 %v986_v44, %v962_v59 }
 0x15b   : > { %v1014_v15 = vpop.permute.xlu1 %1013  ;;  %v956_v16 = vpop.permute.xlu0 %955 }
 0x15c   : > { %v961_v58 = vadd.f32 %v956_v16, %v933_v63  ;;  %v1018_v3 = vadd.f32 %v1014_v15, %v990_v52 }
 0x15f   : > { %v1042_v45 = vpop.permute.xlu1 %1041  ;;  %v984_v51 = vpop.permute.xlu0 %983 }
 0x160   : > { %v989_v2 = vadd.f32 %v984_v51, %v961_v58  ;;  %v1046_v17 = vadd.f32 %v1042_v45, %v1018_v3 }
 0x163   : > { %v1070_v10 = vpop.permute.xlu1 %1069  ;;  %v1012_v35 = vpop.permute.xlu0 %1011 }
 0x164   : > { %v1017_v60 = vadd.f32 %v1012_v35, %v989_v2  ;;  %v1074_v27 = vadd.f32 %v1070_v10, %v1046_v17 }
 0x167   : > { %v1098_v42 = vpop.permute.xlu1 %1097  ;;  %v1040_v18 = vpop.permute.xlu0 %1039 }
 0x168   : > { %v1045_v55 = vadd.f32 %v1040_v18, %v1017_v60  ;;  %v1102_v43 = vadd.f32 %v1098_v42, %v1074_v27 }
 0x16b   : > { %v1119_v13 = vpop.permute.xlu1 %1118  ;;  %v1068_v61 = vpop.permute.xlu0 %1067 }
 0x16c   : > { %v1073_v11 = vadd.f32 %v1068_v61, %v1045_v55  ;;  %v1123_v8 = vadd.f32 %v1119_v13, %v1102_v43 }
 0x16f   : > { %v1147_v25 = vpop.permute.xlu1 %1146  ;;  %v1096_v28 = vpop.permute.xlu0 %1095 }
 0x170   : > { %v1101_v41 = vadd.f32 %v1096_v28, %v1073_v11  ;;  %v1151_v40 = vadd.f32 %v1147_v25, %v1123_v8 }
 0x173   : > { %v1175_v33 = vpop.permute.xlu1 %1174  ;;  %v1117_v31 = vpop.permute.xlu0 %1116 }
 0x174   : > { %v1122_v30 = vadd.f32 %v1117_v31, %v1101_v41  ;;  %v1179_v44 = vadd.f32 %v1175_v33, %v1151_v40 }
 0x177   : > { %v1203_v29 = vpop.permute.xlu1 %1202  ;;  %v1145_v37 = vpop.permute.xlu0 %1144 }
 0x178   : > { %v1150_v20 = vadd.f32 %v1145_v37, %v1122_v30  ;;  %v1207_v22 = vadd.f32 %v1203_v29, %v1179_v44 }
 0x17b   : > { %v1231_v1 = vpop.permute.xlu1 %1230  ;;  %v1173_v32 = vpop.permute.xlu0 %1172 }
 0x17c   : > { %v1178_v51 = vadd.f32 %v1173_v32, %v1150_v20  ;;  %v1235_v45 = vadd.f32 %v1231_v1, %v1207_v22 }
 0x17f   : > { %v1259_v36 = vpop.permute.xlu1 %1258  ;;  %v1201_v54 = vpop.permute.xlu0 %1200 }
 0x180   : > { %v1206_v15 = vadd.f32 %v1201_v54, %v1178_v51  ;;  %v1263_v34 = vadd.f32 %v1259_v36, %v1235_v45 }
 0x183   : > { %v1287_v62 = vpop.permute.xlu1 %1286  ;;  %v1229_v57 = vpop.permute.xlu0 %1228 }
 0x184   : > { %v1234_v18 = vadd.f32 %v1229_v57, %v1206_v15  ;;  %v1291_v42 = vadd.f32 %v1287_v62, %v1263_v34 }
 0x187   : > { %v1308_v4 = vpop.permute.xlu1 %1307  ;;  %v1257_v26 = vpop.permute.xlu0 %1256 }
 0x188   : > { %v1262_v10 = vadd.f32 %v1257_v26, %v1234_v18  ;;  %v1312_v38 = vadd.f32 %v1308_v4, %v1291_v42 }
 0x18b   : > { %v1336_v14 = vpop.permute.xlu1 %1335  ;;  %v1285_v6 = vpop.permute.xlu0 %1284 }
 0x18c   : > { %v1290_v24 = vadd.f32 %v1285_v6, %v1262_v10  ;;  %v1340_v19 = vadd.f32 %v1336_v14, %v1312_v38 }
 0x18f   : > { %v1364_v16 = vpop.permute.xlu1 %1363  ;;  %v1306_v5 = vpop.permute.xlu0 %1305 }
 0x190   : > { %v1311_v13 = vadd.f32 %v1306_v5, %v1290_v24  ;;  %v1368_v9 = vadd.f32 %v1364_v16, %v1340_v19 }
 0x193   : > { %v1334_v35 = vpop.permute.xlu0 %1333  ;;  %v1392_v21 = vpop.permute.xlu1 %1391 }
 0x194   : > { %v1339_v31 = vadd.f32 %v1334_v35, %v1311_v13  ;;  %v1396_v29 = vadd.f32 %v1392_v21, %v1368_v9 }
 0x197   : > { %v1362_v61 = vpop.permute.xlu0 %1361  ;;  %v1420_v28 = vpop.permute.xlu1 %1419 }
 0x198   : > { %v1367_v39 = vadd.f32 %v1362_v61, %v1339_v31  ;;  %v1424_v47 = vadd.f32 %v1420_v28, %v1396_v29 }
 0x19b   : > { %v1390_v23 = vpop.permute.xlu0 %1389  ;;  %v1448_v33 = vpop.permute.xlu1 %1447 }
 0x19c   : > { %v1395_v12 = vadd.f32 %v1390_v23, %v1367_v39  ;;  %v1452_v1 = vadd.f32 %v1448_v33, %v1424_v47 }
 0x19f   : > { %v1418_v25 = vpop.permute.xlu0 %1417  ;;  %v1476_v48 = vpop.permute.xlu1 %1475 }
 0x1a0   : > { %v1423_v46 = vadd.f32 %v1418_v25, %v1395_v12  ;;  %v1480_v53 = vadd.f32 %v1476_v48, %v1452_v1 }
 0x1a3   : > { %v1446_v37 = vpop.permute.xlu0 %1445 }
 0x1a4   : > { %v1451_v49 = vadd.f32 %v1446_v37, %v1423_v46 }
 0x1a7   : > { %v1474_v32 = vpop.permute.xlu0 %1473 }
 0x1a8   : > { %v1479_v50 = vadd.f32 %v1474_v32, %v1451_v49 }
 0x1aa   : > { %1766 = vmatprep.mubr.msk.f32.mxu0 %vm1489_vm6, %v1479_v50 }
 0x1ab   : > { %1767 = vmatmul.mubr.msk.f32.vlgmr.msra.gmra.mxu0 %vm1489_vm6, %v1480_v53 }
 0x26b   : > { %v1768_v7 = vpop.f32.mrf.mxu0 }
 0x26c   : > { %1572 = vst [vmem:[%s204_s30 + $0x8] sm:$0xff] %v1768_v7  ;;  %v1582_v36 = vmul.f32 %v1768_v7, %v1768_v7 }
 0x26d   : > { %v1562_v0 = vpop.f32.mrf.mxu0 }
 0x26e   : > { %1571 = vst [vmem:[%s204_s30] sm:$0xff] %v1562_v0  ;;  %v1573_v54 = vadd.f32 %v1768_v7, %v1562_v0  ;;  %v1581_v63 = vmul.f32 %v1562_v0, %v1562_v0 }
 0x270   : > { %v1574_v56 = vrot.slane %v1573_v54, 4  ;;  %v1583_v58 = vadd.f32 %v1582_v36, %v1581_v63 }
 0x272   : > { %v1575_v59 = vadd.f32 %v1574_v56, %v1573_v54  ;;  %v1584_v62 = vrot.slane %v1583_v58, 4 }
 0x274   : > { %v1576_v57 = vrot.slane %v1575_v59, 2  ;;  %v1585_v2 = vadd.f32 %v1584_v62, %v1583_v58 }
 0x276   : > { %v1577_v52 = vadd.f32 %v1576_v57, %v1575_v59  ;;  %v1586_v60 = vrot.slane %v1585_v2, 2 }
 0x278   : > { %v1578_v3 = vrot.slane %v1577_v52, 1  ;;  %v1587_v4 = vadd.f32 %v1586_v60, %v1585_v2 }
 0x27a   : > { %v1579_v26 = vadd.f32 %v1578_v3, %v1577_v52  ;;  %v1588_v55 = vrot.slane %v1587_v4, 1 }
 0x27c   : > { %1580 = vst [vmem:[%s208_s8] sm:$0x1] %v1579_v26  ;;  %v1589_v17 = vadd.f32 %v1588_v55, %v1587_v4 }
 0x27e   : > { %1590 = vst [vmem:[%s208_s8 + $0x1] sm:$0x1] %v1589_v17 }
 0x27f PF: > { %s15_s15 = sadd.s32 1, %s1799_s15  }
 0x280   : > { %p12_p4 = scmp.ge.s32.totalorder %s15_s15, 4  }
 0x282   :  { %14 = sbr.rel (!%p12_p4) target bundleno = 1 (0x1), region = 74 }

</bundles_post_ra>
